<compile_context>
chip_gen: v6e
topology: v6e:2x2x1
jax: 0.10.0
libtpu: 0.0.40
codegen_flags: <defaults>
</compile_context>

<pallas_src>
import functools

import jax
import jax.numpy as jnp
import numpy as np
from jax import lax
from jax.experimental import pallas as pl
from jax.experimental.pallas import tpu as pltpu


def _round_up(x: int, m: int) -> int:
    return (x + m - 1) // m * m


# ----------------------------------------------------------------------------
# Pallas kernel: one grid step == T_BLK time steps of the GRU recurrence for
# one batch block.  Hidden state is carried across time blocks in VMEM scratch.
# ----------------------------------------------------------------------------
def _clipped_gru_kernel(
    xp_ref,       # (T_BLK, B_blk, 3*H_pad)  precomputed x-side gate pre-activations
    h0_ref,       # (B_blk, H_pad)           initial hidden state
    whh_zr_ref,   # (H_pad, 2*H_pad)         W_hh[:2H].T, gate-padded
    whh_n_ref,    # (H_pad, H_pad)           W_hh[2H:].T, gate-padded
    out_ref,      # (B_blk, T_BLK, H_pad)    batch-major per-step hidden output
    h_scr,        # (B_blk, H_pad)           VMEM scratch carrying recurrent state
    *,
    t_block: int,
    h_pad: int,
    clip_value: float,
):
    t = pl.program_id(1)          # time-block index (inner, sequential)
    H = h_pad

    @pl.when(t == 0)
    def _():
        h_scr[...] = h0_ref[...]

    h = h_scr[...]                       # (B_blk, H_pad) f32
    # Hoist weight loads out of the unrolled time loop.
    w_zr = whh_zr_ref[...]
    w_n = whh_n_ref[...]
    mm_dtype = w_zr.dtype                # f32 or bf16 matmul operands

    for i in range(t_block):             # static unroll (T_BLK is small)
        xi = xp_ref[i]                   # (B_blk, 3*H_pad); lane-aligned gate slots
        x_z = xi[:, 0:H]
        x_r = xi[:, H:2 * H]
        x_n = xi[:, 2 * H:3 * H]

        # hidden @ W_hh[:2H].T  (fused z/r gate matmul, f32 accumulation on MXU)
        h_all = jnp.dot(h.astype(mm_dtype), w_zr,
                        preferred_element_type=jnp.float32)
        z = jax.nn.sigmoid(x_z + h_all[:, 0:H])
        r = jax.nn.sigmoid(x_r + h_all[:, H:2 * H])

        # (r * hidden) @ W_hh_n.T   (LFADS ordering, matching the PyTorch module)
        h_n = jnp.dot((r * h).astype(mm_dtype), w_n,
                      preferred_element_type=jnp.float32)
        n = jnp.tanh(x_n + h_n)

        h = z * h + (1.0 - z) * n
        h = jnp.clip(h, -clip_value, clip_value)

        out_ref[:, i, :] = h             # static-index store into batch-major block

    h_scr[...] = h                       # carry state to the next time block


# ----------------------------------------------------------------------------
# Wrapper: padding, hoisted input projection, pallas_call
# ----------------------------------------------------------------------------
def clipped_gru_forward(
    x_bsd,
    h0,
    params,
    clip_value=float("inf"),
    *,
    t_block: int = 8,
    batch_block: int | None = None,
    recurrent_matmul_dtype=jnp.float32,
):
    """x_bsd: (B, S, D) f32, h0: (B, H) f32 -> (output (B, S, H), h_final (B, H))."""
    B, S, D = x_bsd.shape
    H = h0.shape[-1]

    # ---- padded / blocked sizes -------------------------------------------
    H_pad = _round_up(max(H, 1), 128)            # lane-aligned gates
    B_pad = _round_up(max(B, 1), 8)              # sublane-filled batch
    if batch_block is None:
        batch_block = B_pad
    B_blk = _round_up(batch_block, 8)
    B_pad = _round_up(B_pad, B_blk)
    T_BLK = _round_up(max(t_block, 1), 8)        # satisfies (8,128) on out block
    S_pad = _round_up(S, T_BLK)

    w_ih = jnp.asarray(params["weight_ih"], jnp.float32)   # (3H, D)
    w_hh = jnp.asarray(params["weight_hh"], jnp.float32)   # (3H, H)
    b_ih = jnp.asarray(params["bias_ih"], jnp.float32)     # (3H,)
    b_hh = jnp.asarray(params["bias_hh"], jnp.float32)     # (3H,)

    # Fold bias_hh into bias_ih (exact: both add into the same pre-activations).
    b_tot = b_ih + b_hh

    # ---- gate-padded input-projection weights/bias: (D, 3*H_pad), (3*H_pad,)
    def _pad_gate_w(g):   # (H, D) slice -> (D, H_pad)
        return jnp.pad(w_ih[g * H:(g + 1) * H, :].T, ((0, 0), (0, H_pad - H)))

    def _pad_gate_b(g):
        return jnp.pad(b_tot[g * H:(g + 1) * H], (0, H_pad - H))

    wih_t_pad = jnp.concatenate([_pad_gate_w(g) for g in range(3)], axis=1)
    b_pad = jnp.concatenate([_pad_gate_b(g) for g in range(3)], axis=0)

    # ---- gate-padded recurrent weights (transposed for h @ W on the MXU) ----
    whh_zr_t = jnp.zeros((H_pad, 2 * H_pad), jnp.float32)
    whh_zr_t = whh_zr_t.at[:H, 0:H].set(w_hh[0:H, :].T)                 # z gate
    whh_zr_t = whh_zr_t.at[:H, H_pad:H_pad + H].set(w_hh[H:2 * H, :].T) # r gate
    whh_n_t = jnp.zeros((H_pad, H_pad), jnp.float32)
    whh_n_t = whh_n_t.at[:H, :H].set(w_hh[2 * H:3 * H, :].T)            # n gate

    whh_zr_t = whh_zr_t.astype(recurrent_matmul_dtype)
    whh_n_t = whh_n_t.astype(recurrent_matmul_dtype)

    # ---- hoisted input projection: one big GEMM over the whole sequence ----
    x_sbd = jnp.transpose(jnp.asarray(x_bsd, jnp.float32), (1, 0, 2))   # (S, B, D)
    x_proj = (x_sbd.reshape(S * B, D) @ wih_t_pad + b_pad).reshape(S, B, 3 * H_pad)
    x_proj = jnp.pad(x_proj, ((0, S_pad - S), (0, B_pad - B), (0, 0)))

    # ---- padded initial hidden state (padded lanes stay exactly zero) -------
    h0_pad = jnp.zeros((B_pad, H_pad), jnp.float32).at[:B, :H].set(
        jnp.asarray(h0, jnp.float32))

    n_b = B_pad // B_blk
    n_t = S_pad // T_BLK

    kernel = functools.partial(
        _clipped_gru_kernel,
        t_block=T_BLK,
        h_pad=H_pad,
        clip_value=float(clip_value),
    )

    out_pad = pl.pallas_call(
        kernel,
        out_shape=jax.ShapeDtypeStruct((B_pad, S_pad, H_pad), jnp.float32),
        grid_spec=pltpu.PrefetchScalarGridSpec(
            num_scalar_prefetch=0,
            grid=(n_b, n_t),
            in_specs=[
                pl.BlockSpec((T_BLK, B_blk, 3 * H_pad), lambda b, t: (t, b, 0)),
                pl.BlockSpec((B_blk, H_pad), lambda b, t: (b, 0)),
                pl.BlockSpec((H_pad, 2 * H_pad), lambda b, t: (0, 0)),
                pl.BlockSpec((H_pad, H_pad), lambda b, t: (0, 0)),
            ],
            out_specs=pl.BlockSpec((B_blk, T_BLK, H_pad), lambda b, t: (b, t, 0)),
            scratch_shapes=[pltpu.VMEM((B_blk, H_pad), jnp.float32)],
        ),
        compiler_params=pltpu.CompilerParams(
            # batch blocks are independent (megacore-splittable); time is sequential
            dimension_semantics=("parallel", "arbitrary"),
        ),
    )(x_proj, h0_pad, whh_zr_t, whh_n_t)

    output = out_pad[:B, :S, :H]          # drop batch/time/hidden padding
    h_final = output[:, S - 1, :]         # final hidden == last real time step
    return output, h_final


# ----------------------------------------------------------------------------
# Deterministic parameter init, mirroring init_gru_cell_(is_encoder=True)
# ----------------------------------------------------------------------------
def init_params(key, input_size, hidden_size):
    D, H = input_size, hidden_size
    scale_dim = D + H  # is_encoder=True -> both weights scaled by input+hidden
    std = 1.0 / np.sqrt(scale_dim)
    k1, k2 = jax.random.split(key)
    weight_ih = std * jax.random.normal(k1, (3 * H, D), jnp.float32)
    weight_hh = std * jax.random.normal(k2, (3 * H, H), jnp.float32)
    bias_ih = jnp.concatenate([jnp.ones((2 * H,), jnp.float32),
                               jnp.zeros((H,), jnp.float32)])
    bias_hh = jnp.zeros((3 * H,), jnp.float32)
    return {"weight_ih": weight_ih, "weight_hh": weight_hh,
            "bias_ih": bias_ih, "bias_hh": bias_hh}


# ----------------------------------------------------------------------------
# Pure-JAX reference (mirrors the PyTorch code line-by-line) for validation
# ----------------------------------------------------------------------------
def reference_forward(x_bsd, h0, params, clip_value):
    H = h0.shape[-1]
    w_ih, w_hh = params["weight_ih"], params["weight_hh"]
    b_ih, b_hh = params["bias_ih"], params["bias_hh"]

    def cell(h, x):
        x_all = x @ w_ih.T + b_ih
        x_z, x_r, x_n = x_all[:, :H], x_all[:, H:2 * H], x_all[:, 2 * H:]
        h_all = h @ w_hh[:2 * H].T + b_hh[:2 * H]
        h_z, h_r = h_all[:, :H], h_all[:, H:]
        z = jax.nn.sigmoid(x_z + h_z)
        r = jax.nn.sigmoid(x_r + h_r)
        h_n = (r * h) @ w_hh[2 * H:].T + b_hh[2 * H:]
        n = jnp.tanh(x_n + h_n)
        h_new = jnp.clip(z * h + (1 - z) * n, -clip_value, clip_value)
        return h_new, h_new

    x_sbd = jnp.transpose(x_bsd, (1, 0, 2))
    h_final, outs = lax.scan(cell, h0, x_sbd)
    return jnp.transpose(outs, (1, 0, 2)), h_final


if __name__ == "__main__":
    B, S, D, H = 2, 16, 4, 32      # S=16 with T_BLK=8 -> two time blocks (tests carry)
    CLIP = 5.0

    key = jax.random.PRNGKey(0)
    kx, kh, kp = jax.random.split(key, 3)

    x = jax.random.normal(kx, (B, S, D), jnp.float32)
    h0 = jax.random.normal(kh, (B, H), jnp.float32)
    params = init_params(kp, D, H)

    out_ref, h_ref = reference_forward(x, h0, params, CLIP)

    # Exact-semantics path (f32 recurrent matmuls).  A bf16 recurrent-matmul
    # fast path is available via recurrent_matmul_dtype=jnp.bfloat16 (f32 acc).
    out, h_fin = clipped_gru_forward(x, h0, params, clip_value=CLIP, t_block=8)
    out = jax.block_until_ready(out)
    h_fin = jax.block_until_ready(h_fin)
    np.testing.assert_allclose(np.asarray(out), np.asarray(out_ref),
                               rtol=1e-5, atol=1e-5)
    np.testing.assert_allclose(np.asarray(h_fin), np.asarray(h_ref),
                               rtol=1e-5, atol=1e-5)

    print("KERNEL_OK")
</pallas_src>

<mosaic_0001>
module attributes {stable_mosaic.version = 11 : i64} {
  func.func @_clipped_gru_kernel(%arg0: i32, %arg1: i32, %arg2: memref<8x8x384xf32, #tpu.memory_space<vmem>>, %arg3: memref<8x128xf32, #tpu.memory_space<vmem>>, %arg4: memref<128x256xf32, #tpu.memory_space<vmem>>, %arg5: memref<128x128xf32, #tpu.memory_space<vmem>>, %arg6: memref<8x8x128xf32, #tpu.memory_space<vmem>>, %arg7: memref<8x128xf32, #tpu.memory_space<vmem>>) attributes {dimension_semantics = [#tpu.dimension_semantics<parallel>, #tpu.dimension_semantics<arbitrary>], iteration_bounds = array<i64: 1, 2>, scalar_prefetch = 0 : i64, scratch_operands = 1 : i64, tpu.core_type = #tpu.core_type<tc>, window_params = [{transform_indices = @transform_0, window_bounds = array<i64: 8, 8, 384>}, {transform_indices = @transform_1, window_bounds = array<i64: 8, 128>}, {pipeline_mode = #tpu.pipeline_mode<synchronous>, transform_indices = @transform_2, window_bounds = array<i64: 128, 256>}, {pipeline_mode = #tpu.pipeline_mode<synchronous>, transform_indices = @transform_3, window_bounds = array<i64: 128, 128>}, {transform_indices = @transform_4, window_bounds = array<i64: 8, 8, 128>}]} {
    %c0_i32 = arith.constant 0 : i32
    %0 = arith.cmpi eq, %arg1, %c0_i32 : i32
    %1 = arith.extui %0 : i1 to i32
    %c0_i32_0 = arith.constant 0 : i32
    %2 = arith.cmpi ne, %1, %c0_i32_0 : i32
    scf.if %2 {
      %c0_104 = arith.constant 0 : index
      %c0_105 = arith.constant 0 : index
      %295 = vector.load %arg3[%c0_104, %c0_105] : memref<8x128xf32, #tpu.memory_space<vmem>>, vector<8x128xf32>
      %c0_106 = arith.constant 0 : index
      %c0_107 = arith.constant 0 : index
      %296 = vector.load %arg7[%c0_106, %c0_107] : memref<8x128xf32, #tpu.memory_space<vmem>>, vector<8x128xf32>
      tpu.vector_store %arg7[%c0_106, %c0_107], %295 {strides = array<i32>} : memref<8x128xf32, #tpu.memory_space<vmem>>, vector<8x128xf32>,
    } else {
    }
    %c0 = arith.constant 0 : index
    %c0_1 = arith.constant 0 : index
    %3 = vector.load %arg7[%c0, %c0_1] : memref<8x128xf32, #tpu.memory_space<vmem>>, vector<8x128xf32>
    %c0_2 = arith.constant 0 : index
    %c0_3 = arith.constant 0 : index
    %4 = vector.load %arg4[%c0_2, %c0_3] : memref<128x256xf32, #tpu.memory_space<vmem>>, vector<128x256xf32>
    %c0_4 = arith.constant 0 : index
    %c0_5 = arith.constant 0 : index
    %5 = vector.load %arg5[%c0_4, %c0_5] : memref<128x128xf32, #tpu.memory_space<vmem>>, vector<128x128xf32>
    %c0_6 = arith.constant 0 : index
    %c0_7 = arith.constant 0 : index
    %c0_8 = arith.constant 0 : index
    %6 = vector.load %arg2[%c0_6, %c0_7, %c0_8] : memref<8x8x384xf32, #tpu.memory_space<vmem>>, vector<1x8x384xf32>
    %7 = vector.shape_cast %6 : vector<1x8x384xf32> to vector<8x384xf32>
    %8 = vector.extract_strided_slice %7 {offsets = [0, 0], sizes = [8, 128], strides = [1, 1]} : vector<8x384xf32> to vector<8x128xf32>
    %9 = vector.extract_strided_slice %7 {offsets = [0, 128], sizes = [8, 128], strides = [1, 1]} : vector<8x384xf32> to vector<8x128xf32>
    %10 = vector.extract_strided_slice %7 {offsets = [0, 256], sizes = [8, 128], strides = [1, 1]} : vector<8x384xf32> to vector<8x128xf32>
    %cst = arith.constant dense<0.000000e+00> : vector<8x256xf32>
    %11 = tpu.matmul %3, %4, %cst {dimension_numbers = #tpu.dot_dimension_numbers<[1], [0], [0], [1], [0, 0, 1, 1], [], []>} : vector<8x128xf32>, vector<128x256xf32>, vector<8x256xf32> -> vector<8x256xf32>
    %12 = vector.extract_strided_slice %11 {offsets = [0, 0], sizes = [8, 128], strides = [1, 1]} : vector<8x256xf32> to vector<8x128xf32>
    %13 = arith.addf %8, %12 : vector<8x128xf32>
    %14 = arith.negf %13 : vector<8x128xf32>
    %15 = math.exp %14 : vector<8x128xf32>
    %cst_9 = arith.constant 1.000000e+00 : f32
    %16 = vector.broadcast %cst_9 : f32 to vector<8x128xf32>
    %17 = arith.addf %16, %15 : vector<8x128xf32>
    %18 = arith.divf %16, %17 : vector<8x128xf32>
    %19 = vector.extract_strided_slice %11 {offsets = [0, 128], sizes = [8, 128], strides = [1, 1]} : vector<8x256xf32> to vector<8x128xf32>
    %20 = arith.addf %9, %19 : vector<8x128xf32>
    %21 = arith.negf %20 : vector<8x128xf32>
    %22 = math.exp %21 : vector<8x128xf32>
    %cst_10 = arith.constant 1.000000e+00 : f32
    %23 = vector.broadcast %cst_10 : f32 to vector<8x128xf32>
    %24 = arith.addf %23, %22 : vector<8x128xf32>
    %25 = arith.divf %23, %24 : vector<8x128xf32>
    %26 = arith.mulf %25, %3 : vector<8x128xf32>
    %cst_11 = arith.constant dense<0.000000e+00> : vector<8x128xf32>
    %27 = tpu.matmul %26, %5, %cst_11 {dimension_numbers = #tpu.dot_dimension_numbers<[1], [0], [0], [1], [0, 0, 1, 1], [], []>} : vector<8x128xf32>, vector<128x128xf32>, vector<8x128xf32> -> vector<8x128xf32>
    %28 = arith.addf %10, %27 : vector<8x128xf32>
    %29 = math.tanh %28 : vector<8x128xf32>
    %30 = arith.mulf %18, %3 : vector<8x128xf32>
    %cst_12 = arith.constant 1.000000e+00 : f32
    %31 = vector.broadcast %cst_12 : f32 to vector<8x128xf32>
    %32 = arith.subf %31, %18 : vector<8x128xf32>
    %33 = arith.mulf %32, %29 : vector<8x128xf32>
    %34 = arith.addf %30, %33 : vector<8x128xf32>
    %cst_13 = arith.constant -5.000000e+00 : f32
    %cst_14 = arith.constant 5.000000e+00 : f32
    %35 = vector.broadcast %cst_13 : f32 to vector<8x128xf32>
    %36 = arith.maximumf %35, %34 : vector<8x128xf32>
    %37 = vector.broadcast %cst_14 : f32 to vector<8x128xf32>
    %38 = arith.minimumf %37, %36 : vector<8x128xf32>
    %c0_15 = arith.constant 0 : index
    %c0_16 = arith.constant 0 : index
    %c0_17 = arith.constant 0 : index
    %39 = vector.load %arg6[%c0_15, %c0_16, %c0_17] : memref<8x8x128xf32, #tpu.memory_space<vmem>>, vector<8x1x128xf32>
    %40 = vector.shape_cast %39 : vector<8x1x128xf32> to vector<8x128xf32>
    %41 = vector.shape_cast %38 : vector<8x128xf32> to vector<8x1x128xf32>
    tpu.vector_store %arg6[%c0_15, %c0_16, %c0_17], %41 {strides = array<i32>} : memref<8x8x128xf32, #tpu.memory_space<vmem>>, vector<8x1x128xf32>,
    %c1 = arith.constant 1 : index
    %c0_18 = arith.constant 0 : index
    %c0_19 = arith.constant 0 : index
    %42 = vector.load %arg2[%c1, %c0_18, %c0_19] : memref<8x8x384xf32, #tpu.memory_space<vmem>>, vector<1x8x384xf32>
    %43 = vector.shape_cast %42 : vector<1x8x384xf32> to vector<8x384xf32>
    %44 = vector.extract_strided_slice %43 {offsets = [0, 0], sizes = [8, 128], strides = [1, 1]} : vector<8x384xf32> to vector<8x128xf32>
    %45 = vector.extract_strided_slice %43 {offsets = [0, 128], sizes = [8, 128], strides = [1, 1]} : vector<8x384xf32> to vector<8x128xf32>
    %46 = vector.extract_strided_slice %43 {offsets = [0, 256], sizes = [8, 128], strides = [1, 1]} : vector<8x384xf32> to vector<8x128xf32>
    %cst_20 = arith.constant dense<0.000000e+00> : vector<8x256xf32>
    %47 = tpu.matmul %38, %4, %cst_20 {dimension_numbers = #tpu.dot_dimension_numbers<[1], [0], [0], [1], [0, 0, 1, 1], [], []>} : vector<8x128xf32>, vector<128x256xf32>, vector<8x256xf32> -> vector<8x256xf32>
    %48 = vector.extract_strided_slice %47 {offsets = [0, 0], sizes = [8, 128], strides = [1, 1]} : vector<8x256xf32> to vector<8x128xf32>
    %49 = arith.addf %44, %48 : vector<8x128xf32>
    %50 = arith.negf %49 : vector<8x128xf32>
    %51 = math.exp %50 : vector<8x128xf32>
    %cst_21 = arith.constant 1.000000e+00 : f32
    %52 = vector.broadcast %cst_21 : f32 to vector<8x128xf32>
    %53 = arith.addf %52, %51 : vector<8x128xf32>
    %54 = arith.divf %52, %53 : vector<8x128xf32>
    %55 = vector.extract_strided_slice %47 {offsets = [0, 128], sizes = [8, 128], strides = [1, 1]} : vector<8x256xf32> to vector<8x128xf32>
    %56 = arith.addf %45, %55 : vector<8x128xf32>
    %57 = arith.negf %56 : vector<8x128xf32>
    %58 = math.exp %57 : vector<8x128xf32>
    %cst_22 = arith.constant 1.000000e+00 : f32
    %59 = vector.broadcast %cst_22 : f32 to vector<8x128xf32>
    %60 = arith.addf %59, %58 : vector<8x128xf32>
    %61 = arith.divf %59, %60 : vector<8x128xf32>
    %62 = arith.mulf %61, %38 : vector<8x128xf32>
    %cst_23 = arith.constant dense<0.000000e+00> : vector<8x128xf32>
    %63 = tpu.matmul %62, %5, %cst_23 {dimension_numbers = #tpu.dot_dimension_numbers<[1], [0], [0], [1], [0, 0, 1, 1], [], []>} : vector<8x128xf32>, vector<128x128xf32>, vector<8x128xf32> -> vector<8x128xf32>
    %64 = arith.addf %46, %63 : vector<8x128xf32>
    %65 = math.tanh %64 : vector<8x128xf32>
    %66 = arith.mulf %54, %38 : vector<8x128xf32>
    %cst_24 = arith.constant 1.000000e+00 : f32
    %67 = vector.broadcast %cst_24 : f32 to vector<8x128xf32>
    %68 = arith.subf %67, %54 : vector<8x128xf32>
    %69 = arith.mulf %68, %65 : vector<8x128xf32>
    %70 = arith.addf %66, %69 : vector<8x128xf32>
    %cst_25 = arith.constant -5.000000e+00 : f32
    %cst_26 = arith.constant 5.000000e+00 : f32
    %71 = vector.broadcast %cst_25 : f32 to vector<8x128xf32>
    %72 = arith.maximumf %71, %70 : vector<8x128xf32>
    %73 = vector.broadcast %cst_26 : f32 to vector<8x128xf32>
    %74 = arith.minimumf %73, %72 : vector<8x128xf32>
    %c0_27 = arith.constant 0 : index
    %c1_28 = arith.constant 1 : index
    %c0_29 = arith.constant 0 : index
    %75 = vector.load %arg6[%c0_27, %c1_28, %c0_29] : memref<8x8x128xf32, #tpu.memory_space<vmem>>, vector<8x1x128xf32>
    %76 = vector.shape_cast %75 : vector<8x1x128xf32> to vector<8x128xf32>
    %77 = vector.shape_cast %74 : vector<8x128xf32> to vector<8x1x128xf32>
    tpu.vector_store %arg6[%c0_27, %c1_28, %c0_29], %77 {strides = array<i32>} : memref<8x8x128xf32, #tpu.memory_space<vmem>>, vector<8x1x128xf32>,
    %c2 = arith.constant 2 : index
    %c0_30 = arith.constant 0 : index
    %c0_31 = arith.constant 0 : index
    %78 = vector.load %arg2[%c2, %c0_30, %c0_31] : memref<8x8x384xf32, #tpu.memory_space<vmem>>, vector<1x8x384xf32>
    %79 = vector.shape_cast %78 : vector<1x8x384xf32> to vector<8x384xf32>
    %80 = vector.extract_strided_slice %79 {offsets = [0, 0], sizes = [8, 128], strides = [1, 1]} : vector<8x384xf32> to vector<8x128xf32>
    %81 = vector.extract_strided_slice %79 {offsets = [0, 128], sizes = [8, 128], strides = [1, 1]} : vector<8x384xf32> to vector<8x128xf32>
    %82 = vector.extract_strided_slice %79 {offsets = [0, 256], sizes = [8, 128], strides = [1, 1]} : vector<8x384xf32> to vector<8x128xf32>
    %cst_32 = arith.constant dense<0.000000e+00> : vector<8x256xf32>
    %83 = tpu.matmul %74, %4, %cst_32 {dimension_numbers = #tpu.dot_dimension_numbers<[1], [0], [0], [1], [0, 0, 1, 1], [], []>} : vector<8x128xf32>, vector<128x256xf32>, vector<8x256xf32> -> vector<8x256xf32>
    %84 = vector.extract_strided_slice %83 {offsets = [0, 0], sizes = [8, 128], strides = [1, 1]} : vector<8x256xf32> to vector<8x128xf32>
    %85 = arith.addf %80, %84 : vector<8x128xf32>
    %86 = arith.negf %85 : vector<8x128xf32>
    %87 = math.exp %86 : vector<8x128xf32>
    %cst_33 = arith.constant 1.000000e+00 : f32
    %88 = vector.broadcast %cst_33 : f32 to vector<8x128xf32>
    %89 = arith.addf %88, %87 : vector<8x128xf32>
    %90 = arith.divf %88, %89 : vector<8x128xf32>
    %91 = vector.extract_strided_slice %83 {offsets = [0, 128], sizes = [8, 128], strides = [1, 1]} : vector<8x256xf32> to vector<8x128xf32>
    %92 = arith.addf %81, %91 : vector<8x128xf32>
    %93 = arith.negf %92 : vector<8x128xf32>
    %94 = math.exp %93 : vector<8x128xf32>
    %cst_34 = arith.constant 1.000000e+00 : f32
    %95 = vector.broadcast %cst_34 : f32 to vector<8x128xf32>
    %96 = arith.addf %95, %94 : vector<8x128xf32>
    %97 = arith.divf %95, %96 : vector<8x128xf32>
    %98 = arith.mulf %97, %74 : vector<8x128xf32>
    %cst_35 = arith.constant dense<0.000000e+00> : vector<8x128xf32>
    %99 = tpu.matmul %98, %5, %cst_35 {dimension_numbers = #tpu.dot_dimension_numbers<[1], [0], [0], [1], [0, 0, 1, 1], [], []>} : vector<8x128xf32>, vector<128x128xf32>, vector<8x128xf32> -> vector<8x128xf32>
    %100 = arith.addf %82, %99 : vector<8x128xf32>
    %101 = math.tanh %100 : vector<8x128xf32>
    %102 = arith.mulf %90, %74 : vector<8x128xf32>
    %cst_36 = arith.constant 1.000000e+00 : f32
    %103 = vector.broadcast %cst_36 : f32 to vector<8x128xf32>
    %104 = arith.subf %103, %90 : vector<8x128xf32>
    %105 = arith.mulf %104, %101 : vector<8x128xf32>
    %106 = arith.addf %102, %105 : vector<8x128xf32>
    %cst_37 = arith.constant -5.000000e+00 : f32
    %cst_38 = arith.constant 5.000000e+00 : f32
    %107 = vector.broadcast %cst_37 : f32 to vector<8x128xf32>
    %108 = arith.maximumf %107, %106 : vector<8x128xf32>
    %109 = vector.broadcast %cst_38 : f32 to vector<8x128xf32>
    %110 = arith.minimumf %109, %108 : vector<8x128xf32>
    %c0_39 = arith.constant 0 : index
    %c2_40 = arith.constant 2 : index
    %c0_41 = arith.constant 0 : index
    %111 = vector.load %arg6[%c0_39, %c2_40, %c0_41] : memref<8x8x128xf32, #tpu.memory_space<vmem>>, vector<8x1x128xf32>
    %112 = vector.shape_cast %111 : vector<8x1x128xf32> to vector<8x128xf32>
    %113 = vector.shape_cast %110 : vector<8x128xf32> to vector<8x1x128xf32>
    tpu.vector_store %arg6[%c0_39, %c2_40, %c0_41], %113 {strides = array<i32>} : memref<8x8x128xf32, #tpu.memory_space<vmem>>, vector<8x1x128xf32>,
    %c3 = arith.constant 3 : index
    %c0_42 = arith.constant 0 : index
    %c0_43 = arith.constant 0 : index
    %114 = vector.load %arg2[%c3, %c0_42, %c0_43] : memref<8x8x384xf32, #tpu.memory_space<vmem>>, vector<1x8x384xf32>
    %115 = vector.shape_cast %114 : vector<1x8x384xf32> to vector<8x384xf32>
    %116 = vector.extract_strided_slice %115 {offsets = [0, 0], sizes = [8, 128], strides = [1, 1]} : vector<8x384xf32> to vector<8x128xf32>
    %117 = vector.extract_strided_slice %115 {offsets = [0, 128], sizes = [8, 128], strides = [1, 1]} : vector<8x384xf32> to vector<8x128xf32>
    %118 = vector.extract_strided_slice %115 {offsets = [0, 256], sizes = [8, 128], strides = [1, 1]} : vector<8x384xf32> to vector<8x128xf32>
    %cst_44 = arith.constant dense<0.000000e+00> : vector<8x256xf32>
    %119 = tpu.matmul %110, %4, %cst_44 {dimension_numbers = #tpu.dot_dimension_numbers<[1], [0], [0], [1], [0, 0, 1, 1], [], []>} : vector<8x128xf32>, vector<128x256xf32>, vector<8x256xf32> -> vector<8x256xf32>
    %120 = vector.extract_strided_slice %119 {offsets = [0, 0], sizes = [8, 128], strides = [1, 1]} : vector<8x256xf32> to vector<8x128xf32>
    %121 = arith.addf %116, %120 : vector<8x128xf32>
    %122 = arith.negf %121 : vector<8x128xf32>
    %123 = math.exp %122 : vector<8x128xf32>
    %cst_45 = arith.constant 1.000000e+00 : f32
    %124 = vector.broadcast %cst_45 : f32 to vector<8x128xf32>
    %125 = arith.addf %124, %123 : vector<8x128xf32>
    %126 = arith.divf %124, %125 : vector<8x128xf32>
    %127 = vector.extract_strided_slice %119 {offsets = [0, 128], sizes = [8, 128], strides = [1, 1]} : vector<8x256xf32> to vector<8x128xf32>
    %128 = arith.addf %117, %127 : vector<8x128xf32>
    %129 = arith.negf %128 : vector<8x128xf32>
    %130 = math.exp %129 : vector<8x128xf32>
    %cst_46 = arith.constant 1.000000e+00 : f32
    %131 = vector.broadcast %cst_46 : f32 to vector<8x128xf32>
    %132 = arith.addf %131, %130 : vector<8x128xf32>
    %133 = arith.divf %131, %132 : vector<8x128xf32>
    %134 = arith.mulf %133, %110 : vector<8x128xf32>
    %cst_47 = arith.constant dense<0.000000e+00> : vector<8x128xf32>
    %135 = tpu.matmul %134, %5, %cst_47 {dimension_numbers = #tpu.dot_dimension_numbers<[1], [0], [0], [1], [0, 0, 1, 1], [], []>} : vector<8x128xf32>, vector<128x128xf32>, vector<8x128xf32> -> vector<8x128xf32>
    %136 = arith.addf %118, %135 : vector<8x128xf32>
    %137 = math.tanh %136 : vector<8x128xf32>
    %138 = arith.mulf %126, %110 : vector<8x128xf32>
    %cst_48 = arith.constant 1.000000e+00 : f32
    %139 = vector.broadcast %cst_48 : f32 to vector<8x128xf32>
    %140 = arith.subf %139, %126 : vector<8x128xf32>
    %141 = arith.mulf %140, %137 : vector<8x128xf32>
    %142 = arith.addf %138, %141 : vector<8x128xf32>
    %cst_49 = arith.constant -5.000000e+00 : f32
    %cst_50 = arith.constant 5.000000e+00 : f32
    %143 = vector.broadcast %cst_49 : f32 to vector<8x128xf32>
    %144 = arith.maximumf %143, %142 : vector<8x128xf32>
    %145 = vector.broadcast %cst_50 : f32 to vector<8x128xf32>
    %146 = arith.minimumf %145, %144 : vector<8x128xf32>
    %c0_51 = arith.constant 0 : index
    %c3_52 = arith.constant 3 : index
    %c0_53 = arith.constant 0 : index
    %147 = vector.load %arg6[%c0_51, %c3_52, %c0_53] : memref<8x8x128xf32, #tpu.memory_space<vmem>>, vector<8x1x128xf32>
    %148 = vector.shape_cast %147 : vector<8x1x128xf32> to vector<8x128xf32>
    %149 = vector.shape_cast %146 : vector<8x128xf32> to vector<8x1x128xf32>
    tpu.vector_store %arg6[%c0_51, %c3_52, %c0_53], %149 {strides = array<i32>} : memref<8x8x128xf32, #tpu.memory_space<vmem>>, vector<8x1x128xf32>,
    %c4 = arith.constant 4 : index
    %c0_54 = arith.constant 0 : index
    %c0_55 = arith.constant 0 : index
    %150 = vector.load %arg2[%c4, %c0_54, %c0_55] : memref<8x8x384xf32, #tpu.memory_space<vmem>>, vector<1x8x384xf32>
    %151 = vector.shape_cast %150 : vector<1x8x384xf32> to vector<8x384xf32>
    %152 = vector.extract_strided_slice %151 {offsets = [0, 0], sizes = [8, 128], strides = [1, 1]} : vector<8x384xf32> to vector<8x128xf32>
    %153 = vector.extract_strided_slice %151 {offsets = [0, 128], sizes = [8, 128], strides = [1, 1]} : vector<8x384xf32> to vector<8x128xf32>
    %154 = vector.extract_strided_slice %151 {offsets = [0, 256], sizes = [8, 128], strides = [1, 1]} : vector<8x384xf32> to vector<8x128xf32>
    %cst_56 = arith.constant dense<0.000000e+00> : vector<8x256xf32>
    %155 = tpu.matmul %146, %4, %cst_56 {dimension_numbers = #tpu.dot_dimension_numbers<[1], [0], [0], [1], [0, 0, 1, 1], [], []>} : vector<8x128xf32>, vector<128x256xf32>, vector<8x256xf32> -> vector<8x256xf32>
    %156 = vector.extract_strided_slice %155 {offsets = [0, 0], sizes = [8, 128], strides = [1, 1]} : vector<8x256xf32> to vector<8x128xf32>
    %157 = arith.addf %152, %156 : vector<8x128xf32>
    %158 = arith.negf %157 : vector<8x128xf32>
    %159 = math.exp %158 : vector<8x128xf32>
    %cst_57 = arith.constant 1.000000e+00 : f32
    %160 = vector.broadcast %cst_57 : f32 to vector<8x128xf32>
    %161 = arith.addf %160, %159 : vector<8x128xf32>
    %162 = arith.divf %160, %161 : vector<8x128xf32>
    %163 = vector.extract_strided_slice %155 {offsets = [0, 128], sizes = [8, 128], strides = [1, 1]} : vector<8x256xf32> to vector<8x128xf32>
    %164 = arith.addf %153, %163 : vector<8x128xf32>
    %165 = arith.negf %164 : vector<8x128xf32>
    %166 = math.exp %165 : vector<8x128xf32>
    %cst_58 = arith.constant 1.000000e+00 : f32
    %167 = vector.broadcast %cst_58 : f32 to vector<8x128xf32>
    %168 = arith.addf %167, %166 : vector<8x128xf32>
    %169 = arith.divf %167, %168 : vector<8x128xf32>
    %170 = arith.mulf %169, %146 : vector<8x128xf32>
    %cst_59 = arith.constant dense<0.000000e+00> : vector<8x128xf32>
    %171 = tpu.matmul %170, %5, %cst_59 {dimension_numbers = #tpu.dot_dimension_numbers<[1], [0], [0], [1], [0, 0, 1, 1], [], []>} : vector<8x128xf32>, vector<128x128xf32>, vector<8x128xf32> -> vector<8x128xf32>
    %172 = arith.addf %154, %171 : vector<8x128xf32>
    %173 = math.tanh %172 : vector<8x128xf32>
    %174 = arith.mulf %162, %146 : vector<8x128xf32>
    %cst_60 = arith.constant 1.000000e+00 : f32
    %175 = vector.broadcast %cst_60 : f32 to vector<8x128xf32>
    %176 = arith.subf %175, %162 : vector<8x128xf32>
    %177 = arith.mulf %176, %173 : vector<8x128xf32>
    %178 = arith.addf %174, %177 : vector<8x128xf32>
    %cst_61 = arith.constant -5.000000e+00 : f32
    %cst_62 = arith.constant 5.000000e+00 : f32
    %179 = vector.broadcast %cst_61 : f32 to vector<8x128xf32>
    %180 = arith.maximumf %179, %178 : vector<8x128xf32>
    %181 = vector.broadcast %cst_62 : f32 to vector<8x128xf32>
    %182 = arith.minimumf %181, %180 : vector<8x128xf32>
    %c0_63 = arith.constant 0 : index
    %c4_64 = arith.constant 4 : index
    %c0_65 = arith.constant 0 : index
    %183 = vector.load %arg6[%c0_63, %c4_64, %c0_65] : memref<8x8x128xf32, #tpu.memory_space<vmem>>, vector<8x1x128xf32>
    %184 = vector.shape_cast %183 : vector<8x1x128xf32> to vector<8x128xf32>
    %185 = vector.shape_cast %182 : vector<8x128xf32> to vector<8x1x128xf32>
    tpu.vector_store %arg6[%c0_63, %c4_64, %c0_65], %185 {strides = array<i32>} : memref<8x8x128xf32, #tpu.memory_space<vmem>>, vector<8x1x128xf32>,
    %c5 = arith.constant 5 : index
    %c0_66 = arith.constant 0 : index
    %c0_67 = arith.constant 0 : index
    %186 = vector.load %arg2[%c5, %c0_66, %c0_67] : memref<8x8x384xf32, #tpu.memory_space<vmem>>, vector<1x8x384xf32>
    %187 = vector.shape_cast %186 : vector<1x8x384xf32> to vector<8x384xf32>
    %188 = vector.extract_strided_slice %187 {offsets = [0, 0], sizes = [8, 128], strides = [1, 1]} : vector<8x384xf32> to vector<8x128xf32>
    %189 = vector.extract_strided_slice %187 {offsets = [0, 128], sizes = [8, 128], strides = [1, 1]} : vector<8x384xf32> to vector<8x128xf32>
    %190 = vector.extract_strided_slice %187 {offsets = [0, 256], sizes = [8, 128], strides = [1, 1]} : vector<8x384xf32> to vector<8x128xf32>
    %cst_68 = arith.constant dense<0.000000e+00> : vector<8x256xf32>
    %191 = tpu.matmul %182, %4, %cst_68 {dimension_numbers = #tpu.dot_dimension_numbers<[1], [0], [0], [1], [0, 0, 1, 1], [], []>} : vector<8x128xf32>, vector<128x256xf32>, vector<8x256xf32> -> vector<8x256xf32>
    %192 = vector.extract_strided_slice %191 {offsets = [0, 0], sizes = [8, 128], strides = [1, 1]} : vector<8x256xf32> to vector<8x128xf32>
    %193 = arith.addf %188, %192 : vector<8x128xf32>
    %194 = arith.negf %193 : vector<8x128xf32>
    %195 = math.exp %194 : vector<8x128xf32>
    %cst_69 = arith.constant 1.000000e+00 : f32
    %196 = vector.broadcast %cst_69 : f32 to vector<8x128xf32>
    %197 = arith.addf %196, %195 : vector<8x128xf32>
    %198 = arith.divf %196, %197 : vector<8x128xf32>
    %199 = vector.extract_strided_slice %191 {offsets = [0, 128], sizes = [8, 128], strides = [1, 1]} : vector<8x256xf32> to vector<8x128xf32>
    %200 = arith.addf %189, %199 : vector<8x128xf32>
    %201 = arith.negf %200 : vector<8x128xf32>
    %202 = math.exp %201 : vector<8x128xf32>
    %cst_70 = arith.constant 1.000000e+00 : f32
    %203 = vector.broadcast %cst_70 : f32 to vector<8x128xf32>
    %204 = arith.addf %203, %202 : vector<8x128xf32>
    %205 = arith.divf %203, %204 : vector<8x128xf32>
    %206 = arith.mulf %205, %182 : vector<8x128xf32>
    %cst_71 = arith.constant dense<0.000000e+00> : vector<8x128xf32>
    %207 = tpu.matmul %206, %5, %cst_71 {dimension_numbers = #tpu.dot_dimension_numbers<[1], [0], [0], [1], [0, 0, 1, 1], [], []>} : vector<8x128xf32>, vector<128x128xf32>, vector<8x128xf32> -> vector<8x128xf32>
    %208 = arith.addf %190, %207 : vector<8x128xf32>
    %209 = math.tanh %208 : vector<8x128xf32>
    %210 = arith.mulf %198, %182 : vector<8x128xf32>
    %cst_72 = arith.constant 1.000000e+00 : f32
    %211 = vector.broadcast %cst_72 : f32 to vector<8x128xf32>
    %212 = arith.subf %211, %198 : vector<8x128xf32>
    %213 = arith.mulf %212, %209 : vector<8x128xf32>
    %214 = arith.addf %210, %213 : vector<8x128xf32>
    %cst_73 = arith.constant -5.000000e+00 : f32
    %cst_74 = arith.constant 5.000000e+00 : f32
    %215 = vector.broadcast %cst_73 : f32 to vector<8x128xf32>
    %216 = arith.maximumf %215, %214 : vector<8x128xf32>
    %217 = vector.broadcast %cst_74 : f32 to vector<8x128xf32>
    %218 = arith.minimumf %217, %216 : vector<8x128xf32>
    %c0_75 = arith.constant 0 : index
    %c5_76 = arith.constant 5 : index
    %c0_77 = arith.constant 0 : index
    %219 = vector.load %arg6[%c0_75, %c5_76, %c0_77] : memref<8x8x128xf32, #tpu.memory_space<vmem>>, vector<8x1x128xf32>
    %220 = vector.shape_cast %219 : vector<8x1x128xf32> to vector<8x128xf32>
    %221 = vector.shape_cast %218 : vector<8x128xf32> to vector<8x1x128xf32>
    tpu.vector_store %arg6[%c0_75, %c5_76, %c0_77], %221 {strides = array<i32>} : memref<8x8x128xf32, #tpu.memory_space<vmem>>, vector<8x1x128xf32>,
    %c6 = arith.constant 6 : index
    %c0_78 = arith.constant 0 : index
    %c0_79 = arith.constant 0 : index
    %222 = vector.load %arg2[%c6, %c0_78, %c0_79] : memref<8x8x384xf32, #tpu.memory_space<vmem>>, vector<1x8x384xf32>
    %223 = vector.shape_cast %222 : vector<1x8x384xf32> to vector<8x384xf32>
    %224 = vector.extract_strided_slice %223 {offsets = [0, 0], sizes = [8, 128], strides = [1, 1]} : vector<8x384xf32> to vector<8x128xf32>
    %225 = vector.extract_strided_slice %223 {offsets = [0, 128], sizes = [8, 128], strides = [1, 1]} : vector<8x384xf32> to vector<8x128xf32>
    %226 = vector.extract_strided_slice %223 {offsets = [0, 256], sizes = [8, 128], strides = [1, 1]} : vector<8x384xf32> to vector<8x128xf32>
    %cst_80 = arith.constant dense<0.000000e+00> : vector<8x256xf32>
    %227 = tpu.matmul %218, %4, %cst_80 {dimension_numbers = #tpu.dot_dimension_numbers<[1], [0], [0], [1], [0, 0, 1, 1], [], []>} : vector<8x128xf32>, vector<128x256xf32>, vector<8x256xf32> -> vector<8x256xf32>
    %228 = vector.extract_strided_slice %227 {offsets = [0, 0], sizes = [8, 128], strides = [1, 1]} : vector<8x256xf32> to vector<8x128xf32>
    %229 = arith.addf %224, %228 : vector<8x128xf32>
    %230 = arith.negf %229 : vector<8x128xf32>
    %231 = math.exp %230 : vector<8x128xf32>
    %cst_81 = arith.constant 1.000000e+00 : f32
    %232 = vector.broadcast %cst_81 : f32 to vector<8x128xf32>
    %233 = arith.addf %232, %231 : vector<8x128xf32>
    %234 = arith.divf %232, %233 : vector<8x128xf32>
    %235 = vector.extract_strided_slice %227 {offsets = [0, 128], sizes = [8, 128], strides = [1, 1]} : vector<8x256xf32> to vector<8x128xf32>
    %236 = arith.addf %225, %235 : vector<8x128xf32>
    %237 = arith.negf %236 : vector<8x128xf32>
    %238 = math.exp %237 : vector<8x128xf32>
    %cst_82 = arith.constant 1.000000e+00 : f32
    %239 = vector.broadcast %cst_82 : f32 to vector<8x128xf32>
    %240 = arith.addf %239, %238 : vector<8x128xf32>
    %241 = arith.divf %239, %240 : vector<8x128xf32>
    %242 = arith.mulf %241, %218 : vector<8x128xf32>
    %cst_83 = arith.constant dense<0.000000e+00> : vector<8x128xf32>
    %243 = tpu.matmul %242, %5, %cst_83 {dimension_numbers = #tpu.dot_dimension_numbers<[1], [0], [0], [1], [0, 0, 1, 1], [], []>} : vector<8x128xf32>, vector<128x128xf32>, vector<8x128xf32> -> vector<8x128xf32>
    %244 = arith.addf %226, %243 : vector<8x128xf32>
    %245 = math.tanh %244 : vector<8x128xf32>
    %246 = arith.mulf %234, %218 : vector<8x128xf32>
    %cst_84 = arith.constant 1.000000e+00 : f32
    %247 = vector.broadcast %cst_84 : f32 to vector<8x128xf32>
    %248 = arith.subf %247, %234 : vector<8x128xf32>
    %249 = arith.mulf %248, %245 : vector<8x128xf32>
    %250 = arith.addf %246, %249 : vector<8x128xf32>
    %cst_85 = arith.constant -5.000000e+00 : f32
    %cst_86 = arith.constant 5.000000e+00 : f32
    %251 = vector.broadcast %cst_85 : f32 to vector<8x128xf32>
    %252 = arith.maximumf %251, %250 : vector<8x128xf32>
    %253 = vector.broadcast %cst_86 : f32 to vector<8x128xf32>
    %254 = arith.minimumf %253, %252 : vector<8x128xf32>
    %c0_87 = arith.constant 0 : index
    %c6_88 = arith.constant 6 : index
    %c0_89 = arith.constant 0 : index
    %255 = vector.load %arg6[%c0_87, %c6_88, %c0_89] : memref<8x8x128xf32, #tpu.memory_space<vmem>>, vector<8x1x128xf32>
    %256 = vector.shape_cast %255 : vector<8x1x128xf32> to vector<8x128xf32>
    %257 = vector.shape_cast %254 : vector<8x128xf32> to vector<8x1x128xf32>
    tpu.vector_store %arg6[%c0_87, %c6_88, %c0_89], %257 {strides = array<i32>} : memref<8x8x128xf32, #tpu.memory_space<vmem>>, vector<8x1x128xf32>,
    %c7 = arith.constant 7 : index
    %c0_90 = arith.constant 0 : index
    %c0_91 = arith.constant 0 : index
    %258 = vector.load %arg2[%c7, %c0_90, %c0_91] : memref<8x8x384xf32, #tpu.memory_space<vmem>>, vector<1x8x384xf32>
    %259 = vector.shape_cast %258 : vector<1x8x384xf32> to vector<8x384xf32>
    %260 = vector.extract_strided_slice %259 {offsets = [0, 0], sizes = [8, 128], strides = [1, 1]} : vector<8x384xf32> to vector<8x128xf32>
    %261 = vector.extract_strided_slice %259 {offsets = [0, 128], sizes = [8, 128], strides = [1, 1]} : vector<8x384xf32> to vector<8x128xf32>
    %262 = vector.extract_strided_slice %259 {offsets = [0, 256], sizes = [8, 128], strides = [1, 1]} : vector<8x384xf32> to vector<8x128xf32>
    %cst_92 = arith.constant dense<0.000000e+00> : vector<8x256xf32>
    %263 = tpu.matmul %254, %4, %cst_92 {dimension_numbers = #tpu.dot_dimension_numbers<[1], [0], [0], [1], [0, 0, 1, 1], [], []>} : vector<8x128xf32>, vector<128x256xf32>, vector<8x256xf32> -> vector<8x256xf32>
    %264 = vector.extract_strided_slice %263 {offsets = [0, 0], sizes = [8, 128], strides = [1, 1]} : vector<8x256xf32> to vector<8x128xf32>
    %265 = arith.addf %260, %264 : vector<8x128xf32>
    %266 = arith.negf %265 : vector<8x128xf32>
    %267 = math.exp %266 : vector<8x128xf32>
    %cst_93 = arith.constant 1.000000e+00 : f32
    %268 = vector.broadcast %cst_93 : f32 to vector<8x128xf32>
    %269 = arith.addf %268, %267 : vector<8x128xf32>
    %270 = arith.divf %268, %269 : vector<8x128xf32>
    %271 = vector.extract_strided_slice %263 {offsets = [0, 128], sizes = [8, 128], strides = [1, 1]} : vector<8x256xf32> to vector<8x128xf32>
    %272 = arith.addf %261, %271 : vector<8x128xf32>
    %273 = arith.negf %272 : vector<8x128xf32>
    %274 = math.exp %273 : vector<8x128xf32>
    %cst_94 = arith.constant 1.000000e+00 : f32
    %275 = vector.broadcast %cst_94 : f32 to vector<8x128xf32>
    %276 = arith.addf %275, %274 : vector<8x128xf32>
    %277 = arith.divf %275, %276 : vector<8x128xf32>
    %278 = arith.mulf %277, %254 : vector<8x128xf32>
    %cst_95 = arith.constant dense<0.000000e+00> : vector<8x128xf32>
    %279 = tpu.matmul %278, %5, %cst_95 {dimension_numbers = #tpu.dot_dimension_numbers<[1], [0], [0], [1], [0, 0, 1, 1], [], []>} : vector<8x128xf32>, vector<128x128xf32>, vector<8x128xf32> -> vector<8x128xf32>
    %280 = arith.addf %262, %279 : vector<8x128xf32>
    %281 = math.tanh %280 : vector<8x128xf32>
    %282 = arith.mulf %270, %254 : vector<8x128xf32>
    %cst_96 = arith.constant 1.000000e+00 : f32
    %283 = vector.broadcast %cst_96 : f32 to vector<8x128xf32>
    %284 = arith.subf %283, %270 : vector<8x128xf32>
    %285 = arith.mulf %284, %281 : vector<8x128xf32>
    %286 = arith.addf %282, %285 : vector<8x128xf32>
    %cst_97 = arith.constant -5.000000e+00 : f32
    %cst_98 = arith.constant 5.000000e+00 : f32
    %287 = vector.broadcast %cst_97 : f32 to vector<8x128xf32>
    %288 = arith.maximumf %287, %286 : vector<8x128xf32>
    %289 = vector.broadcast %cst_98 : f32 to vector<8x128xf32>
    %290 = arith.minimumf %289, %288 : vector<8x128xf32>
    %c0_99 = arith.constant 0 : index
    %c7_100 = arith.constant 7 : index
    %c0_101 = arith.constant 0 : index
    %291 = vector.load %arg6[%c0_99, %c7_100, %c0_101] : memref<8x8x128xf32, #tpu.memory_space<vmem>>, vector<8x1x128xf32>
    %292 = vector.shape_cast %291 : vector<8x1x128xf32> to vector<8x128xf32>
    %293 = vector.shape_cast %290 : vector<8x128xf32> to vector<8x1x128xf32>
    tpu.vector_store %arg6[%c0_99, %c7_100, %c0_101], %293 {strides = array<i32>} : memref<8x8x128xf32, #tpu.memory_space<vmem>>, vector<8x1x128xf32>,
    %c0_102 = arith.constant 0 : index
    %c0_103 = arith.constant 0 : index
    %294 = vector.load %arg7[%c0_102, %c0_103] : memref<8x128xf32, #tpu.memory_space<vmem>>, vector<8x128xf32>
    tpu.vector_store %arg7[%c0_102, %c0_103], %290 {strides = array<i32>} : memref<8x128xf32, #tpu.memory_space<vmem>>, vector<8x128xf32>,
    return
  }
  func.func @transform_0(%arg0: i32, %arg1: i32) -> (i32, i32, i32) {
    %c0_i32 = arith.constant 0 : i32
    %c0_i32_0 = arith.constant 0 : i32
    return %arg1, %arg0, %c0_i32 : i32, i32, i32
  }
  func.func @transform_1(%arg0: i32, %arg1: i32) -> (i32, i32) {
    %c0_i32 = arith.constant 0 : i32
    %c0_i32_0 = arith.constant 0 : i32
    return %arg0, %c0_i32 : i32, i32
  }
  func.func @transform_2(%arg0: i32, %arg1: i32) -> (i32, i32) {
    %c0_i32 = arith.constant 0 : i32
    %c0_i32_0 = arith.constant 0 : i32
    %c0_i32_1 = arith.constant 0 : i32
    return %c0_i32, %c0_i32_0 : i32, i32
  }
  func.func @transform_3(%arg0: i32, %arg1: i32) -> (i32, i32) {
    %c0_i32 = arith.constant 0 : i32
    %c0_i32_0 = arith.constant 0 : i32
    %c0_i32_1 = arith.constant 0 : i32
    return %c0_i32, %c0_i32_0 : i32, i32
  }
  func.func @transform_4(%arg0: i32, %arg1: i32) -> (i32, i32, i32) {
    %c0_i32 = arith.constant 0 : i32
    %c0_i32_0 = arith.constant 0 : i32
    return %arg0, %arg1, %c0_i32 : i32, i32, i32
  }
}

</mosaic_0001>

<bundles_post_ra>
// kernel: tpu_custom_call.1
= control target key start
LH: loop header
LB: loop body
LE: loop exit
PB: predicated region body
PF: predicated region fallthrough
CT: control target
= control target key end

     0   :  { %s4457_s0 = inlined_call_operand.hbm [shape: f32[16,8,384], index: 0, kind: input, shape index: {}]   ;;  %s4458_s1 = inlined_call_operand.hbm [shape: f32[8,128], index: 1, kind: input, shape index: {}]   ;;  %s4459_s2 = inlined_call_operand.hbm [shape: f32[128,256], index: 2, kind: input, shape index: {}]   ;;  %s4460_s3 = inlined_call_operand.hbm [shape: f32[128,128], index: 3, kind: input, shape index: {}]   ;;  %s4461_s4 = inlined_call_operand.hbm [shape: f32[8,16,128], index: 4, kind: output, shape index: {}]  }
   0x1   :  { %4484 = sst [smem:[#allocation20_spill]] %s4458_s1 }
   0x2   :  { %4485 = sst [smem:[#allocation21_spill]] %s4459_s2 }
   0x3   :  { %9 = vsyncpa [#allocation4], 0 }
   0x4   :  { %11 = vsyncpa [#allocation4 + $0x1], 0 }
   0x5   :  { %12 = vsyncpa [#allocation7], 0 }
   0x6   :  { %13 = vsyncpa [#allocation10], 0 }
   0x7   :  { %14 = vsyncpa [#allocation5], 0 }
   0x8   :  { %16 = vsyncpa [#allocation5 + $0x1], 0  ;;  %s3333_s15 = smov 0   ;;  %s3335_s16 = smov 0  }
   0x9   :  { %s3337_s17 = smov 0   ;;  %s3339_s18 = smov 0  }
   0xa   :  { %s3341_s19 = smov 0   ;;  %s3343_s20 = smov 0  }
   0xb LB: > { %s2346_s21 = sadd.s32 4294967295, %s3289_s20   ;;  %s2347_s22 = sadd.s32 4294967294, %s3289_s20   ;;  %s3289_s20 = sphi %s3343_s20, %s22_s20   ;;  %s3285_s19 = sphi %s3341_s19, %s4532_s19   ;;  %s3281_s18 = sphi %s3339_s18, %s4531_s18   ;;  %s3277_s17 = sphi %s3337_s17, %s4530_s17   ;;  %s3273_s16 = sphi %s3335_s16, %s4529_s16   ;;  %s3269_s15 = sphi %s3333_s15, %s4528_s15  }
   0xc   : > { %p56_p0 = scmp.ne.s32.totalorder %s3273_s16, %s3269_s15  ;;  %p3367_p1 = scmp.eq.s32.totalorder %s2346_s21, 0 }
   0xd   : > { %p3371_p2 = scmp.eq.s32.totalorder %s2346_s21, 1  ;;  %p156_p3 = scmp.eq.s32.totalorder %s2347_s22, 1 }
   0xe   : > { %s4486_s23 = scalar_select %p3367_p1, 1, 0 }
   0xf   : > { %s4487_s24 = scalar_select %p3371_p2, 1, 0 }
  0x10   : > { %p3377_p4 = por %p3367_p1, %p56_p0  ;;  %p2348_p5 = scmp.ge.s32.totalorder %s3289_s20, 1 }
  0x11   : > { %p3382_p6 = por %p156_p3, %p56_p0  ;;  %p163_p7 = scmp.lt.s32.totalorder %s3289_s20, 3 }
  0x12   : > { %s4488_s25 = scalar_select %p3377_p4, 1, 0 }
  0x13   : > { %s4489_s26 = scalar_select %p3382_p6, 1, 0 }
  0x14   : > { %p3387_p8 = pnand %p2348_p5, %p163_p7  ;;  %s3291_s28 = smov [#allocation6]  }
  0x15   : > { %s178_s29 = sshll.u32 %s3291_s28, 4  ;;  %s3292_s30 = smov [#allocation8]   ;;  %s179_s29 = int_to_ptr.vmem [resolvable:$true] %s178_s29 }
  0x16   : > { %s4490_s27 = scalar_select %p3387_p8, 1, 0 }
  0x17   : > { %p2878_p10 = pneg %p3387_p8  ;;  %s188_s5 = sshll.u32 %s3292_s30, 4  ;;  %s189_s5 = int_to_ptr.vmem [resolvable:$true] %s188_s5 }
  0x18   : > { %s3293_s7 = smov [#allocation9]   ;;  %s3106_s9 = scalar_lea.vmem %s179_s29, 128 }
  0x19   : > { %p3396_p11 = pnand %p2878_p10, %p3367_p1  ;;  %s201_s8 = sshll.u32 %s3293_s7, 4  ;;  %s202_s8 = int_to_ptr.vmem [resolvable:$true] %s201_s8 }
  0x1a   : > { %p3107_p13 = scmp.ne.s32.totalorder %s179_s29, %s3106_s9  ;;  %p3114_p5 = scmp.lt.s32.totalorder %s179_s29, %s179_s29 }
  0x1b   : > { %p3097_p12 = pneg %p3396_p11  ;;  %p3115_p7 = scmp.lt.s32.totalorder %s3106_s9, %s3106_s9 }
  0x1d   : > { %p3109_p0 = pnand %p3107_p13, %p3097_p12  ;;  %p3116_p9 = por %p3115_p7, %p3114_p5 }
  0x1f   : > { %p3110_p3 = pneg %p3109_p0 }
  0x21   : > { %p3117_p10 = pnand %p3116_p9, %p3110_p3 }
  0x23   : > { %3120 = shalt.err (!%p3117_p10)
}
  0x24   : > { %s4492_s1 = sld [smem:[#allocation20_spill]]  ;;  %s3132_s12 = scalar_lea.vmem %s189_s5, 4096 }
  0x25   : > { %p3133_p6 = scmp.ne.s32.totalorder %s189_s5, %s3132_s12  ;;  %p3140_p13 = scmp.lt.s32.totalorder %s189_s5, %s189_s5 }
  0x26   : > { %p3141_p0 = scmp.lt.s32.totalorder %s3132_s12, %s3132_s12 }
  0x27   : > { %p3135_p1 = pnand %p3133_p6, %p3097_p12 }
  0x28   : > { %p3142_p8 = por %p3141_p0, %p3140_p13 }
  0x29   : > { %p3136_p4 = pneg %p3135_p1 }
  0x2a   : > { %2881 = dma.hbm_to_vmem [thread:$0]  (!%p3396_p11), %s4492_s1, 128, %s179_s29, [#allocation7]  }
  0x2b   : > { %p3143_p2 = pnand %p3142_p8, %p3136_p4 }
  0x2d   : > { %3146 = shalt.err (!%p3143_p2)
}
  0x2e   : > { %s3294_s13 = smov 256   ;;  %s3295_s14 = smov 16  }
  0x2f   : > { %s4493_s2 = sld [smem:[#allocation21_spill]]  ;;  %s3158_s28 = scalar_lea.vmem %s202_s8, 2048 }
  0x30   : > { %p3159_p9 = scmp.ne.s32.totalorder %s202_s8, %s3158_s28  ;;  %p3166_p3 = scmp.lt.s32.totalorder %s202_s8, %s202_s8 }
  0x31   : > { %p3167_p5 = scmp.lt.s32.totalorder %s3158_s28, %s3158_s28 }
  0x32   : > { %p3161_p1 = pnand %p3159_p9, %p3097_p12 }
  0x33   : > { %p3168_p4 = por %p3167_p5, %p3166_p3 }
  0x34   : > { %p3162_p6 = pneg %p3161_p1 }
  0x35   : > { %2884 = dma.hbm_to_vmem [thread:$0]  (!%p3396_p11), %s4493_s2, 4096, %s189_s5, [#allocation7], %s3294_s13, %s3294_s13, %s3295_s14  }
  0x36   : > { %p3169_p2 = pnand %p3168_p4, %p3162_p6 }
  0x38   : > { %3172 = shalt.err (!%p3169_p2)
}
  0x39   : > { %s3296_s29 = smov 128   ;;  %s3297_s30 = smov 8  }
  0x3a   : > { %2887 = dma.hbm_to_vmem [thread:$0]  (!%p3396_p11), %s4460_s3, 2048, %s202_s8, [#allocation10], %s3296_s29, %s3296_s29, %s3297_s30  }
  0x3b   : > { %s43_s9 = sadd.s32 1, %s3277_s17  ;;  %s31_s10 = sadd.s32 1, %s3285_s19 }
  0x3c   : > { %p50_p8 = scmp.ne.s32.totalorder %s3277_s17, %s3273_s16  ;;  %p32_p12 = scmp.ge.s32.totalorder %s31_s10, 2 }
  0x3d   : > { %p51_p7 = scmp.eq.s32.totalorder %s3289_s20, 0  ;;  %p4494_p10 = scmp.ne.s32.totalorder %s4487_s24, 0 }
  0x3e   : > { %p2899_p0 = scmp.lt.s32.totalorder %s3289_s20, 2  ;;  %s4534_s10 = smov (%p32_p12, %s31_s10), 0 }
  0x3f   : > { %p3433_p13 = por %p4494_p10, %p50_p8  ;;  %p52_p9 = por %p51_p7, %p50_p8 }
  0x40   : > { %s215_s6 = sand.u32 1, %s3277_s17   ;;  %s38_s12 = ssub.s32 %s3285_s19, %s4534_s10 }
  0x41   : > { %p41_p1 = scmp.eq.s32.totalorder %s38_s12, 0  ;;  %s2859_s8 = smul.u32 192, %s215_s6 }
  0x42   : > { %s2860_s13 = smul.u32 3072, %s3285_s19  ;;  %p3444_p11 = pnand %p2899_p0, %p52_p9 }
  0x43   : > { %s3449_s24 = scalar_select %p41_p1, %s3277_s17, %s43_s9  }
  0x44   : > { %s228_s28 = scalar_lea.hbm %s4457_s0, %s2860_s13  ;;  %s219_s29 = scalar_lea.vmem [#allocation3], %s2859_s8 }
  0x45   : > { %s229_s30 = sshll.u32 %s219_s29, 4  ;;  %s216_s5 = scalar_lea.sflag [#allocation4], %s215_s6  ;;  %s230_s30 = int_to_ptr.vmem [resolvable:$true] %s229_s30 }
  0x46   : > { %p3175_p6 = pneg %p3444_p11  ;;  %s3186_s7 = scalar_lea.vmem %s230_s30, 3072 }
  0x47   : > { %p3187_p3 = scmp.ne.s32.totalorder %s230_s30, %s3186_s7  ;;  %s3298_s12 = smov [#allocation3]  }
  0x48   : > { %s3191_s1 = sshll.u32 %s3298_s12, 4  ;;  %s3192_s1 = int_to_ptr.vmem [resolvable:$false] %s3191_s1 }
  0x49   : > { %p3189_p5 = pnand %p3187_p3, %p3175_p6  ;;  %s3193_s2 = scalar_lea.vmem %s3192_s1, 6144 }
  0x4a   : > { %p3194_p2 = scmp.lt.s32.totalorder %s230_s30, %s3192_s1  ;;  %p3195_p8 = scmp.lt.s32.totalorder %s3193_s2, %s3186_s7 }
  0x4b   : > { %p3190_p4 = pneg %p3189_p5 }
  0x4c   : > { %p3196_p12 = por %p3195_p8, %p3194_p2 }
  0x4e   : > { %p3197_p7 = pnand %p3196_p12, %p3190_p4 }
  0x50   : > { %3200 = shalt.err (!%p3197_p7)
}
  0x51   : > { %s3299_s9 = smov 384   ;;  %s3300_s8 = smov 24  }
  0x52   : > { %2891 = dma.hbm_to_vmem [thread:$0]  (!%p3444_p11), %s228_s28, 3072, %s230_s30, %s216_s5, %s3299_s9, %s3299_s9, %s3300_s8  }
  0x53   : > { %p4497_p10 = scmp.ne.s32.totalorder %s4490_s27, 0 }
  0x55   : > { %241 = sbr.rel (%p4497_p10) target bundleno = 3735 (0xe97), region = 36 }
  0x5a   : > { %s3461_s6 = sand.u32 1, %s3273_s16   ;;  %p4498_p0 = scmp.ne.s32.totalorder %s4488_s25, 0 }
  0x5b   : > { %s2861_s13 = smul.u32 192, %s3461_s6  ;;  %s244_s1 = scalar_lea.sflag [#allocation4], %s3461_s6 }
  0x5d   : > { %s3465_s2 = scalar_lea.vmem [#allocation3], %s2861_s13 }
  0x5e   : > { %3252 = dma.done.wait (%p4498_p0), %s244_s1, 3072  }
  0x5f   : > { %3254 = vsyncadd (%p4498_p0), %s244_s1, 4294964224  ;;  %p4499_p9 = scmp.ne.s32.totalorder %s4486_s23, 0 }
  0x61   : > { %3256 = dma.done.wait (%p4499_p9), [#allocation7], 4224  }
  0x62   : > { %3258 = vsyncadd (%p4499_p9), [#allocation7], 4294963072 }
  0x63   : > { %3260 = dma.done.wait (%p4499_p9), [#allocation10], 2048  }
  0x64   : > { %3262 = vsyncadd (%p4499_p9), [#allocation10], 4294965248  ;;  %s2360_s27 = sshll.u32 %s3461_s6, 6  ;;  %p2361_p1 = scmp.ne.s32.totalorder %s3281_s18, 0 }
  0x65   : > { %s3480_s14 = scalar_lea.vmem [#allocation11], %s2360_s27 }
  0x66   : > { %289 = sbr.rel (%p2361_p1) target bundleno = 109 (0x6d), region = 56 }
  0x6b   : > { %v290_v0 = vld [vmem:[#allocation6] sm:$0xff] }
  0x6c   : > { %291 = vst [vmem:[#allocation2] sm:$0xff] %v290_v0 }
  0x6d PF: > { %v3483_v1 = vld [vmem:[#allocation8 + $0xf8] sm:$0xff]  ;;  %v3485_v2 = vld [vmem:[#allocation8 + $0xf0] sm:$0xff]  ;;  %v3487_v3 = vld [vmem:[#allocation8 + $0xe8] sm:$0xff]  ;;  %v4470_v5 = vmov 0.0   ;;  %vm3302_vm0 = vmmov 0   ;;  %s2440_s23 = sshll.u32 %s3281_s18, 7 }
  0x6e   : > { %344 = vmatprep.subr.mxu0 %v3483_v1  ;;  %v3490_v4 = vld [vmem:[#allocation8 + $0xe0] sm:$0xff]  ;;  %408 = vmatprep.mubr.f32.mxu0 %v4470_v5  ;;  %v3494_v6 = vld [vmem:[#allocation8 + $0xd8] sm:$0xff]  ;;  %v3498_v7 = vld [vmem:[#allocation8 + $0xd0] sm:$0xff]  ;;  %s2229_s25 = sshll.u32 %s3480_s14, 4  ;;  %s4404_s22 = scalar_lea.hbm %s4461_s4, %s2440_s23  ;;  %s4406_s25 = int_to_ptr.vmem [resolvable:$true] %s2229_s25 }
  0x6f   : > { %345 = vmatpush1.msra.mxu0 %v3485_v2  ;;  %2579 = vmatprep.subr.mxu1 %v4470_v5  ;;  %v3501_v8 = vld [vmem:[#allocation8 + $0xc8] sm:$0xff]  ;;  %v3504_v9 = vld [vmem:[#allocation8 + $0xc0] sm:$0xff]  ;;  %v3507_v10 = vld [vmem:[#allocation8 + $0xb8] sm:$0xff]  ;;  %s2214_s28 = scalar_lea.sflag [#allocation5], %s3461_s6  ;;  %s3201_s29 = scalar_lea.vmem %s4406_s25, 1024 }
  0x70   : > { %346 = vmatprep.subr.mxu0 %v3487_v3  ;;  %v3510_v11 = vld [vmem:[#allocation8 + $0xb0] sm:$0xff]  ;;  %v3513_v12 = vld [vmem:[#allocation8 + $0xa8] sm:$0xff]  ;;  %v3516_v13 = vld [vmem:[#allocation8 + $0xa0] sm:$0xff]  ;;  %2611 = vmatprep.mubr.msk.f32.mxu1 %vm3302_vm0, %v4470_v5  ;;  %p3202_p11 = scmp.ne.s32.totalorder %s4406_s25, %s3201_s29  ;;  %s3304_s30 = smov [#allocation11]  }
  0x71   : > { %347 = vmatpush1.msra.mxu0 %v3490_v4  ;;  %v3519_v14 = vld [vmem:[#allocation8 + $0x98] sm:$0xff]  ;;  %v3522_v15 = vld [vmem:[#allocation8 + $0x90] sm:$0xff]  ;;  %v3525_v16 = vld [vmem:[#allocation8 + $0x88] sm:$0xff]  ;;  %s3205_s5 = sshll.u32 %s3304_s30, 4  ;;  %s3206_s5 = int_to_ptr.vmem [resolvable:$false] %s3205_s5 }
  0x72   : > { %348 = vmatprep.subr.mxu0 %v3494_v6  ;;  %v3528_v17 = vld [vmem:[#allocation8 + $0x80] sm:$0xff]  ;;  %v3531_v18 = vld [vmem:[#allocation8 + $0x78] sm:$0xff]  ;;  %v3534_v19 = vld [vmem:[#allocation8 + $0x70] sm:$0xff]  ;;  %p3203_p6 = pnand %p3202_p11, %p3433_p13  ;;  %s3207_s7 = scalar_lea.vmem %s3206_s5, 2048 }
  0x73   : > { %349 = vmatpush1.msra.mxu0 %v3498_v7  ;;  %v3537_v20 = vld [vmem:[#allocation8 + $0x68] sm:$0xff]  ;;  %v3540_v21 = vld [vmem:[#allocation8 + $0x60] sm:$0xff]  ;;  %v3543_v22 = vld [vmem:[#allocation8 + $0x58] sm:$0xff]  ;;  %p3208_p5 = scmp.lt.s32.totalorder %s4406_s25, %s3206_s5  ;;  %p3209_p4 = scmp.lt.s32.totalorder %s3207_s7, %s3201_s29 }
  0x74   : > { %350 = vmatprep.subr.mxu0 %v3501_v8  ;;  %v3546_v23 = vld [vmem:[#allocation8 + $0x50] sm:$0xff]  ;;  %v3549_v24 = vld [vmem:[#allocation8 + $0x48] sm:$0xff]  ;;  %v3552_v25 = vld [vmem:[#allocation8 + $0x40] sm:$0xff]  ;;  %p3204_p3 = pneg %p3203_p6 }
  0x75   : > { %351 = vmatpush1.msra.mxu0 %v3504_v9  ;;  %v3555_v26 = vld [vmem:[#allocation8 + $0x38] sm:$0xff]  ;;  %v3558_v27 = vld [vmem:[#allocation8 + $0x30] sm:$0xff]  ;;  %v3561_v28 = vld [vmem:[#allocation8 + $0x28] sm:$0xff]  ;;  %p3210_p2 = por %p3209_p4, %p3208_p5 }
  0x76   : > { %352 = vmatprep.subr.mxu0 %v3507_v10  ;;  %v3564_v29 = vld [vmem:[#allocation8 + $0x20] sm:$0xff]  ;;  %v3567_v30 = vld [vmem:[#allocation8 + $0x18] sm:$0xff]  ;;  %v3570_v31 = vld [vmem:[#allocation8 + $0x10] sm:$0xff] }
  0x77   : > { %353 = vmatpush1.msra.mxu0 %v3510_v11  ;;  %v3573_v32 = vld [vmem:[#allocation8 + $0x8] sm:$0xff]  ;;  %v3576_v33 = vld [vmem:[#allocation8] sm:$0xff]  ;;  %v3579_v34 = vld [vmem:[#allocation2] sm:$0xff]  ;;  %p3211_p8 = pnand %p3210_p2, %p3204_p3 }
  0x78   : > { %354 = vmatprep.subr.mxu0 %v3513_v12  ;;  %v3618_v35 = vld [vmem:[#allocation9 + $0x78] sm:$0xff]  ;;  %v3622_v36 = vld [vmem:[#allocation9 + $0x70] sm:$0xff]  ;;  %v3626_v37 = vld [vmem:[#allocation9 + $0x68] sm:$0xff] }
  0x79   : > { %355 = vmatpush1.msra.mxu0 %v3516_v13  ;;  %2580 = vmatpush3.msra.mxu1 %v3618_v35  ;;  %v3630_v38 = vld [vmem:[#allocation9 + $0x60] sm:$0xff]  ;;  %v3634_v39 = vld [vmem:[#allocation9 + $0x58] sm:$0xff]  ;;  %v3638_v40 = vld [vmem:[#allocation9 + $0x50] sm:$0xff] }
  0x7a   : > { %356 = vmatprep.subr.mxu0 %v3519_v14  ;;  %2581 = vmatprep.subr.mxu1 %v4470_v5  ;;  %v3642_v41 = vld [vmem:[#allocation9 + $0x48] sm:$0xff]  ;;  %v3646_v42 = vld [vmem:[#allocation9 + $0x40] sm:$0xff]  ;;  %v3650_v43 = vld [vmem:[#allocation9 + $0x38] sm:$0xff] }
  0x7b   : > { %357 = vmatpush1.msra.mxu0 %v3522_v15  ;;  %2582 = vmatpush3.msra.mxu1 %v3622_v36  ;;  %v3652_v44 = vld [vmem:[#allocation9 + $0x30] sm:$0xff]  ;;  %v3658_v45 = vld [vmem:[#allocation9 + $0x28] sm:$0xff]  ;;  %v3662_v46 = vld [vmem:[#allocation9 + $0x20] sm:$0xff] }
  0x7c   : > { %358 = vmatprep.subr.mxu0 %v3525_v16  ;;  %2583 = vmatprep.subr.mxu1 %v4470_v5  ;;  %v3666_v47 = vld [vmem:[#allocation9 + $0x18] sm:$0xff]  ;;  %v3670_v48 = vld [vmem:[#allocation9 + $0x10] sm:$0xff]  ;;  %v3674_v49 = vld [vmem:[#allocation9 + $0x8] sm:$0xff] }
  0x7d   : > { %359 = vmatpush1.msra.mxu0 %v3528_v17  ;;  %2584 = vmatpush3.msra.mxu1 %v3626_v37  ;;  %4500 = vst [vmem:[#allocation16_spill] sm:$0xff] %v3666_v47  ;;  %4501 = vst [vmem:[#allocation17_spill] sm:$0xff] %v3670_v48  ;;  %v3678_v50 = vld [vmem:[#allocation9] sm:$0xff]  ;;  %v341_v60 = vld [vmem:[%s3465_s2] sm:$0xff] }
  0x7e   : > { %360 = vmatprep.subr.mxu0 %v3531_v18  ;;  %2585 = vmatprep.subr.mxu1 %v4470_v5  ;;  %4502 = vst [vmem:[#allocation18_spill] sm:$0xff] %v3674_v49  ;;  %4503 = vst [vmem:[#allocation19_spill] sm:$0xff] %v3678_v50  ;;  %v342_v52 = vld [vmem:[%s3465_s2 + $0x8] sm:$0xff] }
  0x7f   : > { %361 = vmatpush1.msra.mxu0 %v3534_v19  ;;  %2586 = vmatpush3.msra.mxu1 %v3630_v38 }
  0x80   : > { %362 = vmatprep.subr.mxu0 %v3537_v20  ;;  %2587 = vmatprep.subr.mxu1 %v4470_v5 }
  0x81   : > { %363 = vmatpush1.msra.mxu0 %v3540_v21  ;;  %2588 = vmatpush3.msra.mxu1 %v3634_v39 }
  0x82   : > { %364 = vmatprep.subr.mxu0 %v3543_v22  ;;  %2589 = vmatprep.subr.mxu1 %v4470_v5 }
  0x83   : > { %365 = vmatpush1.msra.mxu0 %v3546_v23  ;;  %2590 = vmatpush3.msra.mxu1 %v3638_v40 }
  0x84   : > { %366 = vmatprep.subr.mxu0 %v3549_v24  ;;  %2591 = vmatprep.subr.mxu1 %v4470_v5 }
  0x85   : > { %367 = vmatpush1.msra.mxu0 %v3552_v25  ;;  %2592 = vmatpush3.msra.mxu1 %v3642_v41 }
  0x86   : > { %368 = vmatprep.subr.mxu0 %v3555_v26  ;;  %2593 = vmatprep.subr.mxu1 %v4470_v5 }
  0x87   : > { %369 = vmatpush1.msra.mxu0 %v3558_v27  ;;  %2594 = vmatpush3.msra.mxu1 %v3646_v42 }
  0x88   : > { %370 = vmatprep.subr.mxu0 %v3561_v28  ;;  %2595 = vmatprep.subr.mxu1 %v4470_v5 }
  0x89   : > { %371 = vmatpush1.msra.mxu0 %v3564_v29  ;;  %2596 = vmatpush3.msra.mxu1 %v3650_v43 }
  0x8a   : > { %372 = vmatprep.subr.mxu0 %v3567_v30  ;;  %2597 = vmatprep.subr.mxu1 %v4470_v5 }
  0x8b   : > { %373 = vmatpush1.msra.mxu0 %v3570_v31  ;;  %2598 = vmatpush3.msra.mxu1 %v3652_v44 }
  0x8c   : > { %374 = vmatprep.subr.mxu0 %v3573_v32  ;;  %2599 = vmatprep.subr.mxu1 %v4470_v5 }
  0x8d   : > { %375 = vmatpush1.msra.mxu0 %v3576_v33  ;;  %2600 = vmatpush3.msra.mxu1 %v3658_v45 }
  0x8e   : > { %409 = vmatmul.mubr.f32.vlgmr.msra.gmra.mxu0 %v3579_v34  ;;  %578 = vmatprep.subr.mxu0 %v3483_v1 }
  0x8f   : > { %579 = vmatpush1.msra.mxu0 %v3485_v2  ;;  %642 = vmatprep.mubr.f32.mxu0 %v4470_v5 }
  0x90   : > { %580 = vmatprep.subr.mxu0 %v3487_v3  ;;  %2601 = vmatprep.subr.mxu1 %v4470_v5 }
  0x91   : > { %581 = vmatpush1.msra.mxu0 %v3490_v4  ;;  %2602 = vmatpush3.msra.mxu1 %v3662_v46 }
  0x92   : > { %582 = vmatprep.subr.mxu0 %v3494_v6  ;;  %2603 = vmatprep.subr.mxu1 %v4470_v5 }
  0x93   : > { %583 = vmatpush1.msra.mxu0 %v3498_v7  ;;  %2604 = vmatpush3.msra.mxu1 %v3666_v47 }
  0x94   : > { %584 = vmatprep.subr.mxu0 %v3501_v8  ;;  %2605 = vmatprep.subr.mxu1 %v4470_v5 }
  0x95   : > { %585 = vmatpush1.msra.mxu0 %v3504_v9  ;;  %2606 = vmatpush3.msra.mxu1 %v3670_v48 }
  0x96   : > { %586 = vmatprep.subr.mxu0 %v3507_v10  ;;  %2607 = vmatprep.subr.mxu1 %v4470_v5 }
  0x97   : > { %587 = vmatpush1.msra.mxu0 %v3510_v11  ;;  %2608 = vmatpush3.msra.mxu1 %v3674_v49 }
  0x98   : > { %588 = vmatprep.subr.mxu0 %v3513_v12  ;;  %2609 = vmatprep.subr.mxu1 %v4470_v5 }
  0x99   : > { %589 = vmatpush1.msra.mxu0 %v3516_v13  ;;  %2610 = vmatpush3.msra.mxu1 %v3678_v50 }
  0x9a   : > { %590 = vmatprep.subr.mxu0 %v3519_v14  ;;  %2614 = vmatprep.subr.mxu1 %v4470_v5 }
  0x9b   : > { %591 = vmatpush1.msra.mxu0 %v3522_v15 }
  0x9c   : > { %592 = vmatprep.subr.mxu0 %v3525_v16 }
  0x9d   : > { %593 = vmatpush1.msra.mxu0 %v3528_v17 }
  0x9e   : > { %594 = vmatprep.subr.mxu0 %v3531_v18 }
  0x9f   : > { %595 = vmatpush1.msra.mxu0 %v3534_v19 }
  0xa0   : > { %596 = vmatprep.subr.mxu0 %v3537_v20 }
  0xa1   : > { %597 = vmatpush1.msra.mxu0 %v3540_v21 }
  0xa2   : > { %598 = vmatprep.subr.mxu0 %v3543_v22 }
  0xa3   : > { %599 = vmatpush1.msra.mxu0 %v3546_v23 }
  0xa4   : > { %600 = vmatprep.subr.mxu0 %v3549_v24 }
  0xa5   : > { %601 = vmatpush1.msra.mxu0 %v3552_v25 }
  0xa6   : > { %602 = vmatprep.subr.mxu0 %v3555_v26 }
  0xa7   : > { %603 = vmatpush1.msra.mxu0 %v3558_v27 }
  0xa8   : > { %604 = vmatprep.subr.mxu0 %v3561_v28 }
  0xa9   : > { %605 = vmatpush1.msra.mxu0 %v3564_v29 }
  0xaa   : > { %606 = vmatprep.subr.mxu0 %v3567_v30 }
  0xab   : > { %607 = vmatpush1.msra.mxu0 %v3570_v31 }
  0xac   : > { %608 = vmatprep.subr.mxu0 %v3573_v32 }
  0xad   : > { %609 = vmatpush1.msra.mxu0 %v3576_v33 }
  0xae   : > { %812 = vmatprep.subr.mxu0 %v3483_v1 }
 0x14e   : > { %v410_v51 = vpop.f32.mrf.mxu0 }
 0x14f   : > { %v415_v61 = vadd.f32 %v410_v51, %v341_v60 }
 0x150   : > { %v412_v53 = vpop.f32.mrf.mxu0 }
 0x151   : > { %v422_v54 = vadd.f32 %v412_v53, %v342_v52  ;;  %v2362_v62 = vmul.f32 -1.442695, %v415_v61  ;;  %v343_v52 = vld [vmem:[%s3465_s2 + $0x10] sm:$0xff] }
 0x153   : > { %v2363_v55 = vmul.f32 -1.442695, %v422_v54 }
 0x155   : > { %2967 = vpow2.f32 %v2363_v55 }
 0x162   : > { %v2968_v56 = vpop.eup %2967 }
 0x163   : > { %v426_v57 = vadd.f32 1.0, %v2968_v56  ;;  %v3303_v56 = vmov 1966171168  }
 0x165   : > { %2969 = vrcp.f32 %v426_v57  ;;  %v511_v57 = vunpack.c.l.s4 %v3303_v56 }
 0x166   : > { %2971 = vpow2.f32 %v2362_v62 }
 0x172   : > { %v2970_v58 = vpop.eup %2969 }
 0x173   : > { %v429_v59 = vmul.f32 %v2970_v58, %v3579_v34  ;;  %v2972_v63 = vpop.eup %2971  ;;  %v513_v58 = vlaneseq }
 0x174   : > { %v419_v0 = vadd.f32 1.0, %v2972_v63 }
 0x175   : > { %2612 = vmatmul.mubr.f32.vlgmr.msra.gmra.mxu1 %v429_v59 }
 0x176   : > { %2615 = vmatpush3.msra.mxu1 %v3618_v35  ;;  %2646 = vmatprep.mubr.msk.f32.mxu1 %vm3302_vm0, %v4470_v5  ;;  %2973 = vrcp.f32 %v419_v0 }
 0x177   : > { %2616 = vmatprep.subr.mxu1 %v4470_v5 }
 0x178   : > { %2617 = vmatpush3.msra.mxu1 %v3622_v36 }
 0x179   : > { %2618 = vmatprep.subr.mxu1 %v4470_v5 }
 0x17a   : > { %2619 = vmatpush3.msra.mxu1 %v3626_v37 }
 0x17b   : > { %2620 = vmatprep.subr.mxu1 %v4470_v5 }
 0x17c   : > { %2621 = vmatpush3.msra.mxu1 %v3630_v38 }
 0x17d   : > { %2622 = vmatprep.subr.mxu1 %v4470_v5 }
 0x17e   : > { %2623 = vmatpush3.msra.mxu1 %v3634_v39 }
 0x17f   : > { %2624 = vmatprep.subr.mxu1 %v4470_v5 }
 0x180   : > { %2625 = vmatpush3.msra.mxu1 %v3638_v40 }
 0x181   : > { %2626 = vmatprep.subr.mxu1 %v4470_v5 }
 0x182   : > { %2627 = vmatpush3.msra.mxu1 %v3642_v41 }
 0x183   : > { %2628 = vmatprep.subr.mxu1 %v4470_v5  ;;  %v2974_v59 = vpop.eup %2973 }
 0x184   : > { %2629 = vmatpush3.msra.mxu1 %v3646_v42  ;;  %v502_v51 = vmul.f32 %v2974_v59, %v3579_v34 }
 0x185   : > { %2630 = vmatprep.subr.mxu1 %v4470_v5 }
 0x186   : > { %2631 = vmatpush3.msra.mxu1 %v3650_v43 }
 0x187   : > { %2632 = vmatprep.subr.mxu1 %v4470_v5 }
 0x188   : > { %2633 = vmatpush3.msra.mxu1 %v3652_v44 }
 0x189   : > { %2634 = vmatprep.subr.mxu1 %v4470_v5 }
 0x18a   : > { %2635 = vmatpush3.msra.mxu1 %v3658_v45 }
 0x18b   : > { %2636 = vmatprep.subr.mxu1 %v4470_v5 }
 0x18c   : > { %2637 = vmatpush3.msra.mxu1 %v3662_v46 }
 0x18d   : > { %2638 = vmatprep.subr.mxu1 %v4470_v5 }
 0x18e   : > { %2639 = vmatpush3.msra.mxu1 %v3666_v47 }
 0x18f   : > { %2640 = vmatprep.subr.mxu1 %v4470_v5 }
 0x190   : > { %2641 = vmatpush3.msra.mxu1 %v3670_v48 }
 0x191   : > { %2642 = vmatprep.subr.mxu1 %v4470_v5 }
 0x192   : > { %2643 = vmatpush3.msra.mxu1 %v3674_v49  ;;  %v503_v49 = vsub.f32 1.0, %v2974_v59 }
 0x193   : > { %2644 = vmatprep.subr.mxu1 %v4470_v5 }
 0x194   : > { %2645 = vmatpush3.msra.mxu1 %v3678_v50  ;;  %v512_v50 = vunpack.c.0.s8 %v511_v57 }
 0x195   : > { %2649 = vmatprep.subr.mxu1 %v4470_v5  ;;  %v514_v5 = vshrl.u32 %v513_v58, 7 }
 0x197   : > { %v3723_v62 = vsub.s32 %v512_v50, %v514_v5 }
 0x235   : > { %v496_v53 = vpop.f32.mrf.mxu1 }
 0x236   : > { %v500_v54 = vadd.f32 %v496_v53, %v343_v52  ;;  %v4504_v53 = vmov 0.0  }
 0x237   : > { %v2613_v55 = vpop.f32.mrf.mxu1 }
 0x238   : > { %2975 = vtanh.f32 %v500_v54 }
 0x245   : > { %v2976_v48 = vpop.eup %2975 }
 0x246   : > { %v504_v60 = vmul.f32 %v2976_v48, %v503_v49 }
 0x248   : > { %v505_v61 = vadd.f32 %v504_v60, %v502_v51  ;;  %v2370_v60 = vld [vmem:[%s3465_s2 + $0x20] sm:$0xff] }
 0x24a   : > { %v3725_v63 = vclamps-f32 %v505_v61, 5.0 }
 0x24c   : > { %v509_v0 = vcombine.high %v3725_v63, %v3725_v63  ;;  %v516_v52 = vrot.slane %v3725_v63, %v3723_v62  ;;  %643 = vmatmul.mubr.f32.vlgmr.msra.gmra.mxu0 %v3725_v63 }
 0x24d   : > { %813 = vmatpush1.msra.mxu0 %v3485_v2  ;;  %876 = vmatprep.mubr.f32.mxu0 %v4504_v53 }
 0x24e   : > { %v523_v34 = vrot.slane %v509_v0, %v3723_v62  ;;  %v524_v5 = vcombine.high %v516_v52, %v516_v52  ;;  %v532_v48 = vrot.slane %v516_v52, %v3723_v62  ;;  %2365 = vst.sshfl [vmem:[%s3480_s14] sm:$0x1 pattern:$0x73625140] %v516_v52  ;;  %814 = vmatprep.subr.mxu0 %v3487_v3 }
 0x24f   : > { %815 = vmatpush1.msra.mxu0 %v3490_v4 }
 0x250   : > { %v525_v49 = vcombine.high %v523_v34, %v523_v34  ;;  %v539_v50 = vrot.slane %v523_v34, %v3723_v62  ;;  %v546_v54 = vrot.slane %v524_v5, %v3723_v62  ;;  %v554_v55 = vcombine.high %v532_v48, %v532_v48  ;;  %2366 = vst.sshfl [vmem:[%s3480_s14 + $0x8] sm:$0x1 pattern:$0x73625140] %v524_v5 }
 0x251   : > { %2367 = vst.sshfl [vmem:[%s3480_s14 + $0x20] sm:$0x1 pattern:$0x73625140] %v523_v34  ;;  %816 = vmatprep.subr.mxu0 %v3494_v6 }
 0x252   : > { %817 = vmatpush1.msra.mxu0 %v3498_v7  ;;  %v553_v56 = vrot.slane %v525_v49, %v3723_v62  ;;  %v555_v57 = vcombine.high %v539_v50, %v539_v50  ;;  %v556_v58 = vcombine.high %v546_v54, %v546_v54  ;;  %568 = vst [vmem:[%s3480_s14 + $0x10] sm:$0x1] %v554_v55  ;;  %2368 = vst.sshfl [vmem:[%s3480_s14 + $0x28] sm:$0x1 pattern:$0x73625140] %v525_v49 }
 0x253   : > { %818 = vmatprep.subr.mxu0 %v3501_v8  ;;  %v4505_v50 = vld [vmem:[#allocation17_spill] sm:$0xff]  ;;  %v4506_v54 = vld [vmem:[#allocation18_spill] sm:$0xff]  ;;  %v4507_v55 = vld [vmem:[#allocation19_spill] sm:$0xff] }
 0x254   : > { %819 = vmatpush1.msra.mxu0 %v3504_v9  ;;  %v557_v59 = vcombine.high %v553_v56, %v553_v56  ;;  %569 = vst [vmem:[%s3480_s14 + $0x18] sm:$0x1] %v556_v58  ;;  %572 = vst [vmem:[%s3480_s14 + $0x30] sm:$0x1] %v555_v57  ;;  %v2369_v56 = vld [vmem:[%s3465_s2 + $0x18] sm:$0xff] }
 0x255   : > { %820 = vmatprep.subr.mxu0 %v3507_v10 }
 0x256   : > { %821 = vmatpush1.msra.mxu0 %v3510_v11  ;;  %573 = vst [vmem:[%s3480_s14 + $0x38] sm:$0x1] %v557_v59 }
 0x257   : > { %822 = vmatprep.subr.mxu0 %v3513_v12 }
 0x258   : > { %823 = vmatpush1.msra.mxu0 %v3516_v13 }
 0x259   : > { %824 = vmatprep.subr.mxu0 %v3519_v14 }
 0x25a   : > { %825 = vmatpush1.msra.mxu0 %v3522_v15 }
 0x25b   : > { %826 = vmatprep.subr.mxu0 %v3525_v16 }
 0x25c   : > { %827 = vmatpush1.msra.mxu0 %v3528_v17 }
 0x25d   : > { %828 = vmatprep.subr.mxu0 %v3531_v18 }
 0x25e   : > { %829 = vmatpush1.msra.mxu0 %v3534_v19 }
 0x25f   : > { %830 = vmatprep.subr.mxu0 %v3537_v20 }
 0x260   : > { %831 = vmatpush1.msra.mxu0 %v3540_v21 }
 0x261   : > { %832 = vmatprep.subr.mxu0 %v3543_v22 }
 0x262   : > { %833 = vmatpush1.msra.mxu0 %v3546_v23 }
 0x263   : > { %834 = vmatprep.subr.mxu0 %v3549_v24 }
 0x264   : > { %835 = vmatpush1.msra.mxu0 %v3552_v25 }
 0x265   : > { %836 = vmatprep.subr.mxu0 %v3555_v26 }
 0x266   : > { %837 = vmatpush1.msra.mxu0 %v3558_v27 }
 0x267   : > { %838 = vmatprep.subr.mxu0 %v3561_v28 }
 0x268   : > { %839 = vmatpush1.msra.mxu0 %v3564_v29 }
 0x269   : > { %840 = vmatprep.subr.mxu0 %v3567_v30 }
 0x26a   : > { %841 = vmatpush1.msra.mxu0 %v3570_v31 }
 0x26b   : > { %842 = vmatprep.subr.mxu0 %v3573_v32 }
 0x26c   : > { %843 = vmatpush1.msra.mxu0 %v3576_v33 }
 0x26d   : > { %1046 = vmatprep.subr.mxu0 %v3483_v1 }
 0x30c   : > { %v644_v51 = vpop.f32.mrf.mxu0 }
 0x30d   : > { %v649_v57 = vadd.f32 %v2369_v56, %v644_v51 }
 0x30e   : > { %v646_v61 = vpop.f32.mrf.mxu0 }
 0x30f   : > { %v656_v0 = vadd.f32 %v2370_v60, %v646_v61  ;;  %v2372_v58 = vmul.f32 -1.442695, %v649_v57  ;;  %v2371_v61 = vld [vmem:[%s3465_s2 + $0x28] sm:$0xff] }
 0x311   : > { %v2373_v52 = vmul.f32 -1.442695, %v656_v0 }
 0x313   : > { %2977 = vpow2.f32 %v2373_v52 }
 0x320   : > { %v2978_v34 = vpop.eup %2977 }
 0x321   : > { %v660_v5 = vadd.f32 1.0, %v2978_v34 }
 0x323   : > { %2979 = vrcp.f32 %v660_v5 }
 0x324   : > { %2981 = vpow2.f32 %v2372_v58 }
 0x330   : > { %v2980_v48 = vpop.eup %2979 }
 0x331   : > { %v663_v49 = vmul.f32 %v2980_v48, %v3725_v63  ;;  %v2982_v59 = vpop.eup %2981 }
 0x332   : > { %v653_v60 = vadd.f32 1.0, %v2982_v59 }
 0x333   : > { %2647 = vmatmul.mubr.f32.vlgmr.msra.gmra.mxu1 %v663_v49 }
 0x334   : > { %2650 = vmatpush3.msra.mxu1 %v3618_v35  ;;  %2681 = vmatprep.mubr.msk.f32.mxu1 %vm3302_vm0, %v4504_v53  ;;  %2983 = vrcp.f32 %v653_v60 }
 0x335   : > { %2651 = vmatprep.subr.mxu1 %v4504_v53 }
 0x336   : > { %2652 = vmatpush3.msra.mxu1 %v3622_v36 }
 0x337   : > { %2653 = vmatprep.subr.mxu1 %v4504_v53 }
 0x338   : > { %2654 = vmatpush3.msra.mxu1 %v3626_v37 }
 0x339   : > { %2655 = vmatprep.subr.mxu1 %v4504_v53 }
 0x33a   : > { %2656 = vmatpush3.msra.mxu1 %v3630_v38 }
 0x33b   : > { %2657 = vmatprep.subr.mxu1 %v4504_v53 }
 0x33c   : > { %2658 = vmatpush3.msra.mxu1 %v3634_v39 }
 0x33d   : > { %2659 = vmatprep.subr.mxu1 %v4504_v53 }
 0x33e   : > { %2660 = vmatpush3.msra.mxu1 %v3638_v40 }
 0x33f   : > { %2661 = vmatprep.subr.mxu1 %v4504_v53 }
 0x340   : > { %2662 = vmatpush3.msra.mxu1 %v3642_v41 }
 0x341   : > { %2663 = vmatprep.subr.mxu1 %v4504_v53  ;;  %v2984_v5 = vpop.eup %2983 }
 0x342   : > { %2664 = vmatpush3.msra.mxu1 %v3646_v42  ;;  %v737_v48 = vsub.f32 1.0, %v2984_v5 }
 0x343   : > { %2665 = vmatprep.subr.mxu1 %v4504_v53 }
 0x344   : > { %2666 = vmatpush3.msra.mxu1 %v3650_v43 }
 0x345   : > { %2667 = vmatprep.subr.mxu1 %v4504_v53 }
 0x346   : > { %2668 = vmatpush3.msra.mxu1 %v3652_v44 }
 0x347   : > { %2669 = vmatprep.subr.mxu1 %v4504_v53 }
 0x348   : > { %2670 = vmatpush3.msra.mxu1 %v3658_v45 }
 0x349   : > { %2671 = vmatprep.subr.mxu1 %v4504_v53 }
 0x34a   : > { %2672 = vmatpush3.msra.mxu1 %v3662_v46 }
 0x34b   : > { %2673 = vmatprep.subr.mxu1 %v4504_v53 }
 0x34c   : > { %2674 = vmatpush3.msra.mxu1 %v3666_v47 }
 0x34d   : > { %2675 = vmatprep.subr.mxu1 %v4504_v53 }
 0x34e   : > { %2676 = vmatpush3.msra.mxu1 %v4505_v50 }
 0x34f   : > { %2677 = vmatprep.subr.mxu1 %v4504_v53 }
 0x350   : > { %2678 = vmatpush3.msra.mxu1 %v4506_v54 }
 0x351   : > { %2679 = vmatprep.subr.mxu1 %v4504_v53 }
 0x352   : > { %2680 = vmatpush3.msra.mxu1 %v4507_v55  ;;  %v736_v55 = vmul.f32 %v2984_v5, %v3725_v63  ;;  %v2380_v5 = vld [vmem:[%s3465_s2 + $0x38] sm:$0xff] }
 0x353   : > { %2684 = vmatprep.subr.mxu1 %v4504_v53 }
 0x3f3   : > { %v730_v0 = vpop.f32.mrf.mxu1 }
 0x3f4   : > { %v734_v52 = vadd.f32 %v2371_v61, %v730_v0 }
 0x3f5   : > { %v2648_v34 = vpop.f32.mrf.mxu1 }
 0x3f6   : > { %2985 = vtanh.f32 %v734_v52 }
 0x403   : > { %v2986_v49 = vpop.eup %2985 }
 0x404   : > { %v738_v54 = vmul.f32 %v2986_v49, %v737_v48 }
 0x406   : > { %v739_v50 = vadd.f32 %v738_v54, %v736_v55 }
 0x408   : > { %v3817_v47 = vclamps-f32 %v739_v50, 5.0 }
 0x40a   : > { %v743_v51 = vcombine.high %v3817_v47, %v3817_v47  ;;  %v750_v56 = vrot.slane %v3817_v47, %v3723_v62  ;;  %877 = vmatmul.mubr.f32.vlgmr.msra.gmra.mxu0 %v3817_v47 }
 0x40b   : > { %1047 = vmatpush1.msra.mxu0 %v3485_v2  ;;  %1110 = vmatprep.mubr.f32.mxu0 %v4504_v53 }
 0x40c   : > { %v757_v63 = vrot.slane %v743_v51, %v3723_v62  ;;  %v758_v57 = vcombine.high %v750_v56, %v750_v56  ;;  %v766_v50 = vrot.slane %v750_v56, %v3723_v62  ;;  %2375 = vst.sshfl [vmem:[%s3480_s14 + $0x1] sm:$0x1 pattern:$0x73625140] %v750_v56  ;;  %1048 = vmatprep.subr.mxu0 %v3487_v3 }
 0x40d   : > { %1049 = vmatpush1.msra.mxu0 %v3490_v4 }
 0x40e   : > { %v759_v54 = vcombine.high %v757_v63, %v757_v63  ;;  %v773_v55 = vrot.slane %v757_v63, %v3723_v62  ;;  %v780_v58 = vrot.slane %v758_v57, %v3723_v62  ;;  %v788_v59 = vcombine.high %v766_v50, %v766_v50  ;;  %2376 = vst.sshfl [vmem:[%s3480_s14 + $0x9] sm:$0x1 pattern:$0x73625140] %v758_v57 }
 0x40f   : > { %2377 = vst.sshfl [vmem:[%s3480_s14 + $0x21] sm:$0x1 pattern:$0x73625140] %v757_v63  ;;  %1050 = vmatprep.subr.mxu0 %v3494_v6 }
 0x410   : > { %1051 = vmatpush1.msra.mxu0 %v3498_v7  ;;  %v787_v60 = vrot.slane %v759_v54, %v3723_v62  ;;  %v789_v61 = vcombine.high %v773_v55, %v773_v55  ;;  %v790_v0 = vcombine.high %v780_v58, %v780_v58  ;;  %802 = vst [vmem:[%s3480_s14 + $0x11] sm:$0x1] %v788_v59  ;;  %2378 = vst.sshfl [vmem:[%s3480_s14 + $0x29] sm:$0x1 pattern:$0x73625140] %v759_v54 }
 0x411   : > { %1052 = vmatprep.subr.mxu0 %v3501_v8  ;;  %v4509_v54 = vld [vmem:[#allocation17_spill] sm:$0xff]  ;;  %v4510_v55 = vld [vmem:[#allocation18_spill] sm:$0xff]  ;;  %v4511_v58 = vld [vmem:[#allocation19_spill] sm:$0xff] }
 0x412   : > { %1053 = vmatpush1.msra.mxu0 %v3504_v9  ;;  %v791_v52 = vcombine.high %v787_v60, %v787_v60  ;;  %803 = vst [vmem:[%s3480_s14 + $0x19] sm:$0x1] %v790_v0  ;;  %806 = vst [vmem:[%s3480_s14 + $0x31] sm:$0x1] %v789_v61  ;;  %v2379_v59 = vld [vmem:[%s3465_s2 + $0x30] sm:$0xff] }
 0x413   : > { %1054 = vmatprep.subr.mxu0 %v3507_v10 }
 0x414   : > { %1055 = vmatpush1.msra.mxu0 %v3510_v11  ;;  %807 = vst [vmem:[%s3480_s14 + $0x39] sm:$0x1] %v791_v52 }
 0x415   : > { %1056 = vmatprep.subr.mxu0 %v3513_v12 }
 0x416   : > { %1057 = vmatpush1.msra.mxu0 %v3516_v13 }
 0x417   : > { %1058 = vmatprep.subr.mxu0 %v3519_v14 }
 0x418   : > { %1059 = vmatpush1.msra.mxu0 %v3522_v15 }
 0x419   : > { %1060 = vmatprep.subr.mxu0 %v3525_v16 }
 0x41a   : > { %1061 = vmatpush1.msra.mxu0 %v3528_v17 }
 0x41b   : > { %1062 = vmatprep.subr.mxu0 %v3531_v18 }
 0x41c   : > { %1063 = vmatpush1.msra.mxu0 %v3534_v19 }
 0x41d   : > { %1064 = vmatprep.subr.mxu0 %v3537_v20 }
 0x41e   : > { %1065 = vmatpush1.msra.mxu0 %v3540_v21 }
 0x41f   : > { %1066 = vmatprep.subr.mxu0 %v3543_v22 }
 0x420   : > { %1067 = vmatpush1.msra.mxu0 %v3546_v23 }
 0x421   : > { %1068 = vmatprep.subr.mxu0 %v3549_v24 }
 0x422   : > { %1069 = vmatpush1.msra.mxu0 %v3552_v25 }
 0x423   : > { %1070 = vmatprep.subr.mxu0 %v3555_v26 }
 0x424   : > { %1071 = vmatpush1.msra.mxu0 %v3558_v27 }
 0x425   : > { %1072 = vmatprep.subr.mxu0 %v3561_v28 }
 0x426   : > { %1073 = vmatpush1.msra.mxu0 %v3564_v29 }
 0x427   : > { %1074 = vmatprep.subr.mxu0 %v3567_v30 }
 0x428   : > { %1075 = vmatpush1.msra.mxu0 %v3570_v31 }
 0x429   : > { %1076 = vmatprep.subr.mxu0 %v3573_v32 }
 0x42a   : > { %1077 = vmatpush1.msra.mxu0 %v3576_v33 }
 0x42b   : > { %1280 = vmatprep.subr.mxu0 %v3483_v1  ;;  %v4508_v1 = vld [vmem:[#allocation16_spill] sm:$0xff] }
 0x4ca   : > { %v878_v34 = vpop.f32.mrf.mxu0 }
 0x4cb   : > { %v883_v60 = vadd.f32 %v2379_v59, %v878_v34 }
 0x4cc   : > { %v880_v48 = vpop.f32.mrf.mxu0 }
 0x4cd   : > { %v890_v49 = vadd.f32 %v2380_v5, %v880_v48  ;;  %v2382_v61 = vmul.f32 -1.442695, %v883_v60  ;;  %v2381_v5 = vld [vmem:[%s3465_s2 + $0x40] sm:$0xff] }
 0x4cf   : > { %v2383_v51 = vmul.f32 -1.442695, %v890_v49 }
 0x4d1   : > { %2987 = vpow2.f32 %v2383_v51 }
 0x4de   : > { %v2988_v56 = vpop.eup %2987 }
 0x4df   : > { %v894_v63 = vadd.f32 1.0, %v2988_v56 }
 0x4e1   : > { %2989 = vrcp.f32 %v894_v63 }
 0x4e2   : > { %2991 = vpow2.f32 %v2382_v61 }
 0x4ee   : > { %v2990_v57 = vpop.eup %2989 }
 0x4ef   : > { %v897_v50 = vmul.f32 %v2990_v57, %v3817_v47  ;;  %v2992_v0 = vpop.eup %2991 }
 0x4f0   : > { %v887_v52 = vadd.f32 1.0, %v2992_v0 }
 0x4f1   : > { %2682 = vmatmul.mubr.f32.vlgmr.msra.gmra.mxu1 %v897_v50 }
 0x4f2   : > { %2685 = vmatpush3.msra.mxu1 %v3618_v35  ;;  %2716 = vmatprep.mubr.msk.f32.mxu1 %vm3302_vm0, %v4504_v53  ;;  %2993 = vrcp.f32 %v887_v52 }
 0x4f3   : > { %2686 = vmatprep.subr.mxu1 %v4504_v53 }
 0x4f4   : > { %2687 = vmatpush3.msra.mxu1 %v3622_v36 }
 0x4f5   : > { %2688 = vmatprep.subr.mxu1 %v4504_v53 }
 0x4f6   : > { %2689 = vmatpush3.msra.mxu1 %v3626_v37 }
 0x4f7   : > { %2690 = vmatprep.subr.mxu1 %v4504_v53 }
 0x4f8   : > { %2691 = vmatpush3.msra.mxu1 %v3630_v38 }
 0x4f9   : > { %2692 = vmatprep.subr.mxu1 %v4504_v53 }
 0x4fa   : > { %2693 = vmatpush3.msra.mxu1 %v3634_v39 }
 0x4fb   : > { %2694 = vmatprep.subr.mxu1 %v4504_v53 }
 0x4fc   : > { %2695 = vmatpush3.msra.mxu1 %v3638_v40 }
 0x4fd   : > { %2696 = vmatprep.subr.mxu1 %v4504_v53 }
 0x4fe   : > { %2697 = vmatpush3.msra.mxu1 %v3642_v41 }
 0x4ff   : > { %2698 = vmatprep.subr.mxu1 %v4504_v53  ;;  %v2994_v56 = vpop.eup %2993 }
 0x500   : > { %2699 = vmatpush3.msra.mxu1 %v3646_v42  ;;  %v971_v63 = vsub.f32 1.0, %v2994_v56  ;;  %v970_v50 = vmul.f32 %v2994_v56, %v3817_v47 }
 0x501   : > { %2700 = vmatprep.subr.mxu1 %v4504_v53 }
 0x502   : > { %2701 = vmatpush3.msra.mxu1 %v3650_v43 }
 0x503   : > { %2702 = vmatprep.subr.mxu1 %v4504_v53 }
 0x504   : > { %2703 = vmatpush3.msra.mxu1 %v3652_v44 }
 0x505   : > { %2704 = vmatprep.subr.mxu1 %v4504_v53 }
 0x506   : > { %2705 = vmatpush3.msra.mxu1 %v3658_v45 }
 0x507   : > { %2706 = vmatprep.subr.mxu1 %v4504_v53 }
 0x508   : > { %2707 = vmatpush3.msra.mxu1 %v3662_v46 }
 0x509   : > { %2708 = vmatprep.subr.mxu1 %v4504_v53 }
 0x50a   : > { %2709 = vmatpush3.msra.mxu1 %v4508_v1 }
 0x50b   : > { %2710 = vmatprep.subr.mxu1 %v4504_v53 }
 0x50c   : > { %2711 = vmatpush3.msra.mxu1 %v4509_v54 }
 0x50d   : > { %2712 = vmatprep.subr.mxu1 %v4504_v53 }
 0x50e   : > { %2713 = vmatpush3.msra.mxu1 %v4510_v55 }
 0x50f   : > { %2714 = vmatprep.subr.mxu1 %v4504_v53 }
 0x510   : > { %2715 = vmatpush3.msra.mxu1 %v4511_v58 }
 0x511   : > { %2719 = vmatprep.subr.mxu1 %v4504_v53 }
 0x5b1   : > { %v964_v48 = vpop.f32.mrf.mxu1 }
 0x5b2   : > { %v968_v49 = vadd.f32 %v2381_v5, %v964_v48  ;;  %v4030_v48 = vld [vmem:[#allocation8 + $0xd0] sm:$0xff] }
 0x5b3   : > { %v2683_v51 = vpop.f32.mrf.mxu1 }
 0x5b4   : > { %2995 = vtanh.f32 %v968_v49 }
 0x5c1   : > { %v2996_v57 = vpop.eup %2995 }
 0x5c2   : > { %v972_v58 = vmul.f32 %v2996_v57, %v971_v63  ;;  %v4036_v63 = vld [vmem:[#allocation8 + $0xc8] sm:$0xff]  ;;  %v4039_v57 = vld [vmem:[#allocation8 + $0xc0] sm:$0xff] }
 0x5c4   : > { %v973_v55 = vadd.f32 %v972_v58, %v970_v50 }
 0x5c6   : > { %v3909_v54 = vclamps-f32 %v973_v55, 5.0 }
 0x5c8   : > { %v977_v34 = vcombine.high %v3909_v54, %v3909_v54  ;;  %v984_v59 = vrot.slane %v3909_v54, %v3723_v62  ;;  %1111 = vmatmul.mubr.f32.vlgmr.msra.gmra.mxu0 %v3909_v54 }
 0x5c9   : > { %1281 = vmatpush1.msra.mxu0 %v3485_v2  ;;  %1344 = vmatprep.mubr.f32.mxu0 %v4504_v53 }
 0x5ca   : > { %v991_v47 = vrot.slane %v977_v34, %v3723_v62  ;;  %v992_v60 = vcombine.high %v984_v59, %v984_v59  ;;  %v1000_v55 = vrot.slane %v984_v59, %v3723_v62  ;;  %2385 = vst.sshfl [vmem:[%s3480_s14 + $0x2] sm:$0x1 pattern:$0x73625140] %v984_v59  ;;  %1282 = vmatprep.subr.mxu0 %v3487_v3  ;;  %v4044_v34 = vld [vmem:[#allocation8 + $0xb8] sm:$0xff]  ;;  %v4047_v59 = vld [vmem:[#allocation8 + $0xb0] sm:$0xff] }
 0x5cb   : > { %1283 = vmatpush1.msra.mxu0 %v3490_v4 }
 0x5cc   : > { %v993_v58 = vcombine.high %v991_v47, %v991_v47  ;;  %v1007_v61 = vrot.slane %v991_v47, %v3723_v62  ;;  %v1014_v2 = vrot.slane %v992_v60, %v3723_v62  ;;  %v1022_v0 = vcombine.high %v1000_v55, %v1000_v55  ;;  %2386 = vst.sshfl [vmem:[%s3480_s14 + $0xa] sm:$0x1 pattern:$0x73625140] %v992_v60  ;;  %v4054_v60 = vld [vmem:[#allocation8 + $0xa0] sm:$0xff]  ;;  %v4057_v55 = vld [vmem:[#allocation8 + $0x98] sm:$0xff] }
 0x5cd   : > { %2387 = vst.sshfl [vmem:[%s3480_s14 + $0x22] sm:$0x1 pattern:$0x73625140] %v991_v47  ;;  %1284 = vmatprep.subr.mxu0 %v3494_v6  ;;  %v3961_v6 = vld [vmem:[#allocation8 + $0xf8] sm:$0xff]  ;;  %v4051_v47 = vld [vmem:[#allocation8 + $0xa8] sm:$0xff] }
 0x5ce   : > { %1285 = vmatpush1.msra.mxu0 %v3498_v7  ;;  %v1021_v52 = vrot.slane %v993_v58, %v3723_v62  ;;  %v1023_v3 = vcombine.high %v1007_v61, %v1007_v61  ;;  %v1024_v5 = vcombine.high %v1014_v2, %v1014_v2  ;;  %1036 = vst [vmem:[%s3480_s14 + $0x12] sm:$0x1] %v1022_v0  ;;  %2388 = vst.sshfl [vmem:[%s3480_s14 + $0x2a] sm:$0x1 pattern:$0x73625140] %v993_v58 }
 0x5cf   : > { %1286 = vmatprep.subr.mxu0 %v3501_v8  ;;  %v2390_v8 = vld [vmem:[%s3465_s2 + $0x50] sm:$0xff]  ;;  %v4060_v58 = vld [vmem:[#allocation8 + $0x90] sm:$0xff]  ;;  %v4066_v2 = vld [vmem:[#allocation8 + $0x80] sm:$0xff] }
 0x5d0   : > { %1287 = vmatpush1.msra.mxu0 %v3504_v9  ;;  %v1025_v4 = vcombine.high %v1021_v52, %v1021_v52  ;;  %1037 = vst [vmem:[%s3480_s14 + $0x1a] sm:$0x1] %v1024_v5  ;;  %1040 = vst [vmem:[%s3480_s14 + $0x32] sm:$0x1] %v1023_v3  ;;  %v4063_v61 = vld [vmem:[#allocation8 + $0x88] sm:$0xff]  ;;  %v4069_v0 = vld [vmem:[#allocation8 + $0x78] sm:$0xff] }
 0x5d1   : > { %1288 = vmatprep.subr.mxu0 %v3507_v10  ;;  %v4072_v52 = vld [vmem:[#allocation8 + $0x70] sm:$0xff]  ;;  %v4075_v3 = vld [vmem:[#allocation8 + $0x68] sm:$0xff]  ;;  %v4078_v5 = vld [vmem:[#allocation8 + $0x60] sm:$0xff] }
 0x5d2   : > { %1289 = vmatpush1.msra.mxu0 %v3510_v11  ;;  %1041 = vst [vmem:[%s3480_s14 + $0x3a] sm:$0x1] %v1025_v4  ;;  %v4081_v4 = vld [vmem:[#allocation8 + $0x58] sm:$0xff] }
 0x5d3   : > { %1290 = vmatprep.subr.mxu0 %v3513_v12 }
 0x5d4   : > { %1291 = vmatpush1.msra.mxu0 %v3516_v13 }
 0x5d5   : > { %1292 = vmatprep.subr.mxu0 %v3519_v14 }
 0x5d6   : > { %1293 = vmatpush1.msra.mxu0 %v3522_v15 }
 0x5d7   : > { %1294 = vmatprep.subr.mxu0 %v3525_v16  ;;  %v4512_v16 = vld [vmem:[#allocation17_spill] sm:$0xff] }
 0x5d8   : > { %1295 = vmatpush1.msra.mxu0 %v3528_v17  ;;  %v4513_v17 = vld [vmem:[#allocation18_spill] sm:$0xff] }
 0x5d9   : > { %1296 = vmatprep.subr.mxu0 %v3531_v18  ;;  %v4514_v18 = vld [vmem:[#allocation19_spill] sm:$0xff] }
 0x5da   : > { %1297 = vmatpush1.msra.mxu0 %v3534_v19  ;;  %v2389_v19 = vld [vmem:[%s3465_s2 + $0x48] sm:$0xff] }
 0x5db   : > { %1298 = vmatprep.subr.mxu0 %v3537_v20 }
 0x5dc   : > { %1299 = vmatpush1.msra.mxu0 %v3540_v21 }
 0x5dd   : > { %1300 = vmatprep.subr.mxu0 %v3543_v22 }
 0x5de   : > { %1301 = vmatpush1.msra.mxu0 %v3546_v23 }
 0x5df   : > { %1302 = vmatprep.subr.mxu0 %v3549_v24  ;;  %v2391_v24 = vld [vmem:[%s3465_s2 + $0x58] sm:$0xff] }
 0x5e0   : > { %1303 = vmatpush1.msra.mxu0 %v3552_v25 }
 0x5e1   : > { %1304 = vmatprep.subr.mxu0 %v3555_v26 }
 0x5e2   : > { %1305 = vmatpush1.msra.mxu0 %v3558_v27 }
 0x5e3   : > { %1306 = vmatprep.subr.mxu0 %v3561_v28 }
 0x5e4   : > { %1307 = vmatpush1.msra.mxu0 %v3564_v29 }
 0x5e5   : > { %1308 = vmatprep.subr.mxu0 %v3567_v30 }
 0x5e6   : > { %1309 = vmatpush1.msra.mxu0 %v3570_v31 }
 0x5e7   : > { %1310 = vmatprep.subr.mxu0 %v3573_v32 }
 0x5e8   : > { %1311 = vmatpush1.msra.mxu0 %v3576_v33 }
 0x5e9   : > { %1514 = vmatprep.subr.mxu0 %v3961_v6 }
 0x688   : > { %v1112_v7 = vpop.f32.mrf.mxu0 }
 0x689   : > { %v1117_v20 = vadd.f32 %v2389_v19, %v1112_v7  ;;  %v4084_v7 = vld [vmem:[#allocation8 + $0x50] sm:$0xff]  ;;  %v2400_v19 = vld [vmem:[%s3465_s2 + $0x68] sm:$0xff] }
 0x68a   : > { %v1114_v9 = vpop.f32.mrf.mxu0 }
 0x68b   : > { %v1124_v10 = vadd.f32 %v2390_v8, %v1114_v9  ;;  %v2392_v21 = vmul.f32 -1.442695, %v1117_v20  ;;  %v4087_v8 = vld [vmem:[#allocation8 + $0x48] sm:$0xff]  ;;  %v4090_v9 = vld [vmem:[#allocation8 + $0x40] sm:$0xff] }
 0x68d   : > { %v2393_v11 = vmul.f32 -1.442695, %v1124_v10  ;;  %v4093_v10 = vld [vmem:[#allocation8 + $0x38] sm:$0xff] }
 0x68f   : > { %2997 = vpow2.f32 %v2393_v11  ;;  %v4096_v11 = vld [vmem:[#allocation8 + $0x30] sm:$0xff] }
 0x69c   : > { %v2998_v12 = vpop.eup %2997 }
 0x69d   : > { %v1128_v13 = vadd.f32 1.0, %v2998_v12  ;;  %v4099_v12 = vld [vmem:[#allocation8 + $0x28] sm:$0xff] }
 0x69f   : > { %2999 = vrcp.f32 %v1128_v13  ;;  %v4102_v13 = vld [vmem:[#allocation8 + $0x20] sm:$0xff] }
 0x6a0   : > { %3001 = vpow2.f32 %v2392_v21 }
 0x6ac   : > { %v3000_v14 = vpop.eup %2999 }
 0x6ad   : > { %v1131_v15 = vmul.f32 %v3000_v14, %v3909_v54  ;;  %v3002_v22 = vpop.eup %3001  ;;  %v4105_v14 = vld [vmem:[#allocation8 + $0x18] sm:$0xff] }
 0x6ae   : > { %v1121_v23 = vadd.f32 1.0, %v3002_v22 }
 0x6af   : > { %2717 = vmatmul.mubr.f32.vlgmr.msra.gmra.mxu1 %v1131_v15  ;;  %v4108_v15 = vld [vmem:[#allocation8 + $0x10] sm:$0xff] }
 0x6b0   : > { %2720 = vmatpush3.msra.mxu1 %v3618_v35  ;;  %2751 = vmatprep.mubr.msk.f32.mxu1 %vm3302_vm0, %v4504_v53  ;;  %3003 = vrcp.f32 %v1121_v23 }
 0x6b1   : > { %2721 = vmatprep.subr.mxu1 %v4504_v53 }
 0x6b2   : > { %2722 = vmatpush3.msra.mxu1 %v3622_v36 }
 0x6b3   : > { %2723 = vmatprep.subr.mxu1 %v4504_v53 }
 0x6b4   : > { %2724 = vmatpush3.msra.mxu1 %v3626_v37 }
 0x6b5   : > { %2725 = vmatprep.subr.mxu1 %v4504_v53 }
 0x6b6   : > { %2726 = vmatpush3.msra.mxu1 %v3630_v38  ;;  %v4010_v38 = vld [vmem:[#allocation8 + $0xf0] sm:$0xff] }
 0x6b7   : > { %2727 = vmatprep.subr.mxu1 %v4504_v53 }
 0x6b8   : > { %2728 = vmatpush3.msra.mxu1 %v3634_v39 }
 0x6b9   : > { %2729 = vmatprep.subr.mxu1 %v4504_v53 }
 0x6ba   : > { %2730 = vmatpush3.msra.mxu1 %v3638_v40 }
 0x6bb   : > { %2731 = vmatprep.subr.mxu1 %v4504_v53 }
 0x6bc   : > { %2732 = vmatpush3.msra.mxu1 %v3642_v41 }
 0x6bd   : > { %2733 = vmatprep.subr.mxu1 %v4504_v53  ;;  %v3004_v28 = vpop.eup %3003 }
 0x6be   : > { %2734 = vmatpush3.msra.mxu1 %v3646_v42  ;;  %v1205_v29 = vsub.f32 1.0, %v3004_v28  ;;  %v1204_v31 = vmul.f32 %v3004_v28, %v3909_v54  ;;  %v4017_v42 = vld [vmem:[#allocation8 + $0xe8] sm:$0xff]  ;;  %v4027_v54 = vld [vmem:[#allocation8 + $0xd8] sm:$0xff]  ;;  %v4126_v28 = vld [vmem:[#allocation9 + $0x70] sm:$0xff] }
 0x6bf   : > { %2735 = vmatprep.subr.mxu1 %v4504_v53 }
 0x6c0   : > { %2736 = vmatpush3.msra.mxu1 %v3650_v43  ;;  %v4020_v43 = vld [vmem:[#allocation8 + $0xe0] sm:$0xff] }
 0x6c1   : > { %2737 = vmatprep.subr.mxu1 %v4504_v53 }
 0x6c2   : > { %2738 = vmatpush3.msra.mxu1 %v3652_v44 }
 0x6c3   : > { %2739 = vmatprep.subr.mxu1 %v4504_v53 }
 0x6c4   : > { %2740 = vmatpush3.msra.mxu1 %v3658_v45 }
 0x6c5   : > { %2741 = vmatprep.subr.mxu1 %v4504_v53 }
 0x6c6   : > { %2742 = vmatpush3.msra.mxu1 %v3662_v46 }
 0x6c7   : > { %2743 = vmatprep.subr.mxu1 %v4504_v53 }
 0x6c8   : > { %2744 = vmatpush3.msra.mxu1 %v4508_v1 }
 0x6c9   : > { %2745 = vmatprep.subr.mxu1 %v4504_v53 }
 0x6ca   : > { %2746 = vmatpush3.msra.mxu1 %v4512_v16  ;;  %v4111_v16 = vld [vmem:[#allocation8 + $0x8] sm:$0xff] }
 0x6cb   : > { %2747 = vmatprep.subr.mxu1 %v4504_v53 }
 0x6cc   : > { %2748 = vmatpush3.msra.mxu1 %v4513_v17  ;;  %v4114_v17 = vld [vmem:[#allocation8] sm:$0xff] }
 0x6cd   : > { %2749 = vmatprep.subr.mxu1 %v4504_v53 }
 0x6ce   : > { %2750 = vmatpush3.msra.mxu1 %v4514_v18 }
 0x6cf   : > { %2754 = vmatprep.subr.mxu1 %v4504_v53 }
 0x76f   : > { %v1198_v25 = vpop.f32.mrf.mxu1 }
 0x770   : > { %v1202_v26 = vadd.f32 %v2391_v24, %v1198_v25 }
 0x771   : > { %v2718_v27 = vpop.f32.mrf.mxu1 }
 0x772   : > { %3005 = vtanh.f32 %v1202_v26  ;;  %v4120_v27 = vld [vmem:[#allocation9 + $0x78] sm:$0xff] }
 0x77f   : > { %v3006_v30 = vpop.eup %3005 }
 0x780   : > { %v1206_v32 = vmul.f32 %v3006_v30, %v1205_v29  ;;  %v4130_v29 = vld [vmem:[#allocation9 + $0x68] sm:$0xff]  ;;  %v4134_v30 = vld [vmem:[#allocation9 + $0x60] sm:$0xff] }
 0x782   : > { %v1207_v33 = vadd.f32 %v1206_v32, %v1204_v31  ;;  %v4138_v31 = vld [vmem:[#allocation9 + $0x58] sm:$0xff]  ;;  %v4142_v32 = vld [vmem:[#allocation9 + $0x50] sm:$0xff] }
 0x784   : > { %v4003_v35 = vclamps-f32 %v1207_v33, 5.0  ;;  %v4146_v33 = vld [vmem:[#allocation9 + $0x48] sm:$0xff] }
 0x786   : > { %v1211_v36 = vcombine.high %v4003_v35, %v4003_v35  ;;  %v1218_v37 = vrot.slane %v4003_v35, %v3723_v62  ;;  %1345 = vmatmul.mubr.f32.vlgmr.msra.gmra.mxu0 %v4003_v35 }
 0x787   : > { %1515 = vmatpush1.msra.mxu0 %v4010_v38  ;;  %1578 = vmatprep.mubr.f32.mxu0 %v4504_v53 }
 0x788   : > { %v1225_v39 = vrot.slane %v1211_v36, %v3723_v62  ;;  %v1226_v40 = vcombine.high %v1218_v37, %v1218_v37  ;;  %v1234_v41 = vrot.slane %v1218_v37, %v3723_v62  ;;  %2395 = vst.sshfl [vmem:[%s3480_s14 + $0x3] sm:$0x1 pattern:$0x73625140] %v1218_v37  ;;  %1516 = vmatprep.subr.mxu0 %v4017_v42  ;;  %v4150_v36 = vld [vmem:[#allocation9 + $0x40] sm:$0xff]  ;;  %v4154_v37 = vld [vmem:[#allocation9 + $0x38] sm:$0xff] }
 0x789   : > { %1517 = vmatpush1.msra.mxu0 %v4020_v43 }
 0x78a   : > { %v1227_v44 = vcombine.high %v1225_v39, %v1225_v39  ;;  %v1241_v45 = vrot.slane %v1225_v39, %v3723_v62  ;;  %v1248_v46 = vrot.slane %v1226_v40, %v3723_v62  ;;  %v1256_v1 = vcombine.high %v1234_v41, %v1234_v41  ;;  %2396 = vst.sshfl [vmem:[%s3480_s14 + $0xb] sm:$0x1 pattern:$0x73625140] %v1226_v40  ;;  %v4162_v40 = vld [vmem:[#allocation9 + $0x28] sm:$0xff]  ;;  %v4166_v41 = vld [vmem:[#allocation9 + $0x20] sm:$0xff] }
 0x78b   : > { %2397 = vst.sshfl [vmem:[%s3480_s14 + $0x23] sm:$0x1 pattern:$0x73625140] %v1225_v39  ;;  %1518 = vmatprep.subr.mxu0 %v4027_v54  ;;  %v4158_v39 = vld [vmem:[#allocation9 + $0x30] sm:$0xff] }
 0x78c   : > { %1519 = vmatpush1.msra.mxu0 %v4030_v48  ;;  %v1255_v49 = vrot.slane %v1227_v44, %v3723_v62  ;;  %v1257_v51 = vcombine.high %v1241_v45, %v1241_v45  ;;  %v1258_v56 = vcombine.high %v1248_v46, %v1248_v46  ;;  %1270 = vst [vmem:[%s3480_s14 + $0x13] sm:$0x1] %v1256_v1  ;;  %2398 = vst.sshfl [vmem:[%s3480_s14 + $0x2b] sm:$0x1 pattern:$0x73625140] %v1227_v44 }
 0x78d   : > { %1520 = vmatprep.subr.mxu0 %v4036_v63  ;;  %v4170_v44 = vld [vmem:[#allocation9 + $0x18] sm:$0xff]  ;;  %v4174_v45 = vld [vmem:[#allocation9 + $0x10] sm:$0xff]  ;;  %v4178_v46 = vld [vmem:[#allocation9 + $0x8] sm:$0xff] }
 0x78e   : > { %1521 = vmatpush1.msra.mxu0 %v4039_v57  ;;  %v1259_v50 = vcombine.high %v1255_v49, %v1255_v49  ;;  %1271 = vst [vmem:[%s3480_s14 + $0x1b] sm:$0x1] %v1258_v56  ;;  %1274 = vst [vmem:[%s3480_s14 + $0x33] sm:$0x1] %v1257_v51  ;;  %v4182_v1 = vld [vmem:[#allocation9] sm:$0xff]  ;;  %v2399_v49 = vld [vmem:[%s3465_s2 + $0x60] sm:$0xff] }
 0x78f   : > { %1522 = vmatprep.subr.mxu0 %v4044_v34  ;;  %4515 = vst [vmem:[#allocation16_spill] sm:$0xff] %v4170_v44  ;;  %4516 = vst [vmem:[#allocation17_spill] sm:$0xff] %v4174_v45 }
 0x790   : > { %1523 = vmatpush1.msra.mxu0 %v4047_v59  ;;  %1275 = vst [vmem:[%s3480_s14 + $0x3b] sm:$0x1] %v1259_v50  ;;  %4517 = vst [vmem:[#allocation18_spill] sm:$0xff] %v4178_v46 }
 0x791   : > { %1524 = vmatprep.subr.mxu0 %v4051_v47  ;;  %4518 = vst [vmem:[#allocation19_spill] sm:$0xff] %v4182_v1 }
 0x792   : > { %1525 = vmatpush1.msra.mxu0 %v4054_v60 }
 0x793   : > { %1526 = vmatprep.subr.mxu0 %v4057_v55 }
 0x794   : > { %1527 = vmatpush1.msra.mxu0 %v4060_v58 }
 0x795   : > { %1528 = vmatprep.subr.mxu0 %v4063_v61 }
 0x796   : > { %1529 = vmatpush1.msra.mxu0 %v4066_v2 }
 0x797   : > { %1530 = vmatprep.subr.mxu0 %v4069_v0 }
 0x798   : > { %1531 = vmatpush1.msra.mxu0 %v4072_v52 }
 0x799   : > { %1532 = vmatprep.subr.mxu0 %v4075_v3 }
 0x79a   : > { %1533 = vmatpush1.msra.mxu0 %v4078_v5 }
 0x79b   : > { %1534 = vmatprep.subr.mxu0 %v4081_v4 }
 0x79c   : > { %1535 = vmatpush1.msra.mxu0 %v4084_v7 }
 0x79d   : > { %1536 = vmatprep.subr.mxu0 %v4087_v8 }
 0x79e   : > { %1537 = vmatpush1.msra.mxu0 %v4090_v9 }
 0x79f   : > { %1538 = vmatprep.subr.mxu0 %v4093_v10 }
 0x7a0   : > { %1539 = vmatpush1.msra.mxu0 %v4096_v11 }
 0x7a1   : > { %1540 = vmatprep.subr.mxu0 %v4099_v12 }
 0x7a2   : > { %1541 = vmatpush1.msra.mxu0 %v4102_v13 }
 0x7a3   : > { %1542 = vmatprep.subr.mxu0 %v4105_v14 }
 0x7a4   : > { %1543 = vmatpush1.msra.mxu0 %v4108_v15 }
 0x7a5   : > { %1544 = vmatprep.subr.mxu0 %v4111_v16 }
 0x7a6   : > { %1545 = vmatpush1.msra.mxu0 %v4114_v17 }
 0x7a7   : > { %1748 = vmatprep.subr.mxu0 %v3961_v6 }
 0x846   : > { %v1346_v18 = vpop.f32.mrf.mxu0 }
 0x847   : > { %v1351_v51 = vadd.f32 %v2399_v49, %v1346_v18 }
 0x848   : > { %v1348_v20 = vpop.f32.mrf.mxu0 }
 0x849   : > { %v1358_v21 = vadd.f32 %v2400_v19, %v1348_v20  ;;  %v2402_v56 = vmul.f32 -1.442695, %v1351_v51  ;;  %v2401_v20 = vld [vmem:[%s3465_s2 + $0x70] sm:$0xff] }
 0x84b   : > { %v2403_v22 = vmul.f32 -1.442695, %v1358_v21 }
 0x84d   : > { %3007 = vpow2.f32 %v2403_v22 }
 0x85a   : > { %v3008_v23 = vpop.eup %3007 }
 0x85b   : > { %v1362_v24 = vadd.f32 1.0, %v3008_v23 }
 0x85d   : > { %3009 = vrcp.f32 %v1362_v24 }
 0x85e   : > { %3011 = vpow2.f32 %v2402_v56 }
 0x86a   : > { %v3010_v25 = vpop.eup %3009 }
 0x86b   : > { %v1365_v26 = vmul.f32 %v3010_v25, %v4003_v35  ;;  %v3012_v50 = vpop.eup %3011 }
 0x86c   : > { %v1355_v19 = vadd.f32 1.0, %v3012_v50 }
 0x86d   : > { %2752 = vmatmul.mubr.f32.vlgmr.msra.gmra.mxu1 %v1365_v26 }
 0x86e   : > { %2755 = vmatpush3.msra.mxu1 %v4120_v27  ;;  %2786 = vmatprep.mubr.msk.f32.mxu1 %vm3302_vm0, %v4504_v53  ;;  %3013 = vrcp.f32 %v1355_v19 }
 0x86f   : > { %2756 = vmatprep.subr.mxu1 %v4504_v53 }
 0x870   : > { %2757 = vmatpush3.msra.mxu1 %v4126_v28 }
 0x871   : > { %2758 = vmatprep.subr.mxu1 %v4504_v53 }
 0x872   : > { %2759 = vmatpush3.msra.mxu1 %v4130_v29 }
 0x873   : > { %2760 = vmatprep.subr.mxu1 %v4504_v53 }
 0x874   : > { %2761 = vmatpush3.msra.mxu1 %v4134_v30 }
 0x875   : > { %2762 = vmatprep.subr.mxu1 %v4504_v53 }
 0x876   : > { %2763 = vmatpush3.msra.mxu1 %v4138_v31 }
 0x877   : > { %2764 = vmatprep.subr.mxu1 %v4504_v53 }
 0x878   : > { %2765 = vmatpush3.msra.mxu1 %v4142_v32 }
 0x879   : > { %2766 = vmatprep.subr.mxu1 %v4504_v53 }
 0x87a   : > { %2767 = vmatpush3.msra.mxu1 %v4146_v33 }
 0x87b   : > { %2768 = vmatprep.subr.mxu1 %v4504_v53  ;;  %v3014_v24 = vpop.eup %3013 }
 0x87c   : > { %2769 = vmatpush3.msra.mxu1 %v4150_v36  ;;  %v1439_v25 = vsub.f32 1.0, %v3014_v24 }
 0x87d   : > { %2770 = vmatprep.subr.mxu1 %v4504_v53 }
 0x87e   : > { %2771 = vmatpush3.msra.mxu1 %v4154_v37 }
 0x87f   : > { %2772 = vmatprep.subr.mxu1 %v4504_v53 }
 0x880   : > { %2773 = vmatpush3.msra.mxu1 %v4158_v39 }
 0x881   : > { %2774 = vmatprep.subr.mxu1 %v4504_v53 }
 0x882   : > { %2775 = vmatpush3.msra.mxu1 %v4162_v40 }
 0x883   : > { %2776 = vmatprep.subr.mxu1 %v4504_v53 }
 0x884   : > { %2777 = vmatpush3.msra.mxu1 %v4166_v41 }
 0x885   : > { %2778 = vmatprep.subr.mxu1 %v4504_v53 }
 0x886   : > { %2779 = vmatpush3.msra.mxu1 %v4170_v44 }
 0x887   : > { %2780 = vmatprep.subr.mxu1 %v4504_v53 }
 0x888   : > { %2781 = vmatpush3.msra.mxu1 %v4174_v45 }
 0x889   : > { %2782 = vmatprep.subr.mxu1 %v4504_v53 }
 0x88a   : > { %2783 = vmatpush3.msra.mxu1 %v4178_v46 }
 0x88b   : > { %2784 = vmatprep.subr.mxu1 %v4504_v53 }
 0x88c   : > { %2785 = vmatpush3.msra.mxu1 %v4182_v1  ;;  %v1438_v1 = vmul.f32 %v3014_v24, %v4003_v35  ;;  %v2410_v24 = vld [vmem:[%s3465_s2 + $0x80] sm:$0xff] }
 0x88d   : > { %2789 = vmatprep.subr.mxu1 %v4504_v53 }
 0x92d   : > { %v1432_v21 = vpop.f32.mrf.mxu1 }
 0x92e   : > { %v1436_v22 = vadd.f32 %v2401_v20, %v1432_v21 }
 0x92f   : > { %v2753_v23 = vpop.f32.mrf.mxu1 }
 0x930   : > { %3015 = vtanh.f32 %v1436_v22 }
 0x93d   : > { %v3016_v26 = vpop.eup %3015 }
 0x93e   : > { %v1440_v46 = vmul.f32 %v3016_v26, %v1439_v25 }
 0x940   : > { %v1441_v45 = vadd.f32 %v1440_v46, %v1438_v1 }
 0x942   : > { %v4189_v44 = vclamps-f32 %v1441_v45, 5.0 }
 0x944   : > { %v1445_v18 = vcombine.high %v4189_v44, %v4189_v44  ;;  %v1452_v49 = vrot.slane %v4189_v44, %v3723_v62  ;;  %1579 = vmatmul.mubr.f32.vlgmr.msra.gmra.mxu0 %v4189_v44 }
 0x945   : > { %1749 = vmatpush1.msra.mxu0 %v4010_v38  ;;  %1812 = vmatprep.mubr.f32.mxu0 %v4504_v53 }
 0x946   : > { %v1459_v35 = vrot.slane %v1445_v18, %v3723_v62  ;;  %v1460_v51 = vcombine.high %v1452_v49, %v1452_v49  ;;  %v1468_v45 = vrot.slane %v1452_v49, %v3723_v62  ;;  %2405 = vst.sshfl [vmem:[%s3480_s14 + $0x4] sm:$0x1 pattern:$0x73625140] %v1452_v49  ;;  %1750 = vmatprep.subr.mxu0 %v4017_v42 }
 0x947   : > { %1751 = vmatpush1.msra.mxu0 %v4020_v43 }
 0x948   : > { %v1461_v46 = vcombine.high %v1459_v35, %v1459_v35  ;;  %v1475_v1 = vrot.slane %v1459_v35, %v3723_v62  ;;  %v1482_v56 = vrot.slane %v1460_v51, %v3723_v62  ;;  %v1490_v50 = vcombine.high %v1468_v45, %v1468_v45  ;;  %2406 = vst.sshfl [vmem:[%s3480_s14 + $0xc] sm:$0x1 pattern:$0x73625140] %v1460_v51 }
 0x949   : > { %2407 = vst.sshfl [vmem:[%s3480_s14 + $0x24] sm:$0x1 pattern:$0x73625140] %v1459_v35  ;;  %1752 = vmatprep.subr.mxu0 %v4027_v54 }
 0x94a   : > { %1753 = vmatpush1.msra.mxu0 %v4030_v48  ;;  %v1489_v19 = vrot.slane %v1461_v46, %v3723_v62  ;;  %v1491_v20 = vcombine.high %v1475_v1, %v1475_v1  ;;  %v1492_v21 = vcombine.high %v1482_v56, %v1482_v56  ;;  %1504 = vst [vmem:[%s3480_s14 + $0x14] sm:$0x1] %v1490_v50  ;;  %2408 = vst.sshfl [vmem:[%s3480_s14 + $0x2c] sm:$0x1 pattern:$0x73625140] %v1461_v46 }
 0x94b   : > { %1754 = vmatprep.subr.mxu0 %v4036_v63  ;;  %v4520_v46 = vld [vmem:[#allocation17_spill] sm:$0xff]  ;;  %v4521_v1 = vld [vmem:[#allocation18_spill] sm:$0xff]  ;;  %v4522_v56 = vld [vmem:[#allocation19_spill] sm:$0xff] }
 0x94c   : > { %1755 = vmatpush1.msra.mxu0 %v4039_v57  ;;  %v1493_v22 = vcombine.high %v1489_v19, %v1489_v19  ;;  %1505 = vst [vmem:[%s3480_s14 + $0x1c] sm:$0x1] %v1492_v21  ;;  %1508 = vst [vmem:[%s3480_s14 + $0x34] sm:$0x1] %v1491_v20  ;;  %v2409_v50 = vld [vmem:[%s3465_s2 + $0x78] sm:$0xff] }
 0x94d   : > { %1756 = vmatprep.subr.mxu0 %v4044_v34 }
 0x94e   : > { %1757 = vmatpush1.msra.mxu0 %v4047_v59  ;;  %1509 = vst [vmem:[%s3480_s14 + $0x3c] sm:$0x1] %v1493_v22 }
 0x94f   : > { %1758 = vmatprep.subr.mxu0 %v4051_v47 }
 0x950   : > { %1759 = vmatpush1.msra.mxu0 %v4054_v60 }
 0x951   : > { %1760 = vmatprep.subr.mxu0 %v4057_v55 }
 0x952   : > { %1761 = vmatpush1.msra.mxu0 %v4060_v58 }
 0x953   : > { %1762 = vmatprep.subr.mxu0 %v4063_v61 }
 0x954   : > { %1763 = vmatpush1.msra.mxu0 %v4066_v2 }
 0x955   : > { %1764 = vmatprep.subr.mxu0 %v4069_v0 }
 0x956   : > { %1765 = vmatpush1.msra.mxu0 %v4072_v52 }
 0x957   : > { %1766 = vmatprep.subr.mxu0 %v4075_v3 }
 0x958   : > { %1767 = vmatpush1.msra.mxu0 %v4078_v5 }
 0x959   : > { %1768 = vmatprep.subr.mxu0 %v4081_v4 }
 0x95a   : > { %1769 = vmatpush1.msra.mxu0 %v4084_v7 }
 0x95b   : > { %1770 = vmatprep.subr.mxu0 %v4087_v8 }
 0x95c   : > { %1771 = vmatpush1.msra.mxu0 %v4090_v9 }
 0x95d   : > { %1772 = vmatprep.subr.mxu0 %v4093_v10 }
 0x95e   : > { %1773 = vmatpush1.msra.mxu0 %v4096_v11 }
 0x95f   : > { %1774 = vmatprep.subr.mxu0 %v4099_v12 }
 0x960   : > { %1775 = vmatpush1.msra.mxu0 %v4102_v13 }
 0x961   : > { %1776 = vmatprep.subr.mxu0 %v4105_v14 }
 0x962   : > { %1777 = vmatpush1.msra.mxu0 %v4108_v15 }
 0x963   : > { %1778 = vmatprep.subr.mxu0 %v4111_v16 }
 0x964   : > { %1779 = vmatpush1.msra.mxu0 %v4114_v17 }
 0x965   : > { %1982 = vmatprep.subr.mxu0 %v3961_v6  ;;  %v4519_v6 = vld [vmem:[#allocation16_spill] sm:$0xff] }
 0xa04   : > { %v1580_v23 = vpop.f32.mrf.mxu0 }
 0xa05   : > { %v1585_v19 = vadd.f32 %v2409_v50, %v1580_v23 }
 0xa06   : > { %v1582_v25 = vpop.f32.mrf.mxu0 }
 0xa07   : > { %v1592_v26 = vadd.f32 %v2410_v24, %v1582_v25  ;;  %v2412_v20 = vmul.f32 -1.442695, %v1585_v19  ;;  %v2411_v24 = vld [vmem:[%s3465_s2 + $0x88] sm:$0xff] }
 0xa09   : > { %v2413_v18 = vmul.f32 -1.442695, %v1592_v26 }
 0xa0b   : > { %3017 = vpow2.f32 %v2413_v18 }
 0xa18   : > { %v3018_v49 = vpop.eup %3017 }
 0xa19   : > { %v1596_v35 = vadd.f32 1.0, %v3018_v49 }
 0xa1b   : > { %3019 = vrcp.f32 %v1596_v35 }
 0xa1c   : > { %3021 = vpow2.f32 %v2412_v20 }
 0xa28   : > { %v3020_v51 = vpop.eup %3019 }
 0xa29   : > { %v1599_v45 = vmul.f32 %v3020_v51, %v4189_v44  ;;  %v3022_v21 = vpop.eup %3021 }
 0xa2a   : > { %v1589_v22 = vadd.f32 1.0, %v3022_v21 }
 0xa2b   : > { %2787 = vmatmul.mubr.f32.vlgmr.msra.gmra.mxu1 %v1599_v45 }
 0xa2c   : > { %2790 = vmatpush3.msra.mxu1 %v4120_v27  ;;  %2821 = vmatprep.mubr.msk.f32.mxu1 %vm3302_vm0, %v4504_v53  ;;  %3023 = vrcp.f32 %v1589_v22 }
 0xa2d   : > { %2791 = vmatprep.subr.mxu1 %v4504_v53 }
 0xa2e   : > { %2792 = vmatpush3.msra.mxu1 %v4126_v28 }
 0xa2f   : > { %2793 = vmatprep.subr.mxu1 %v4504_v53 }
 0xa30   : > { %2794 = vmatpush3.msra.mxu1 %v4130_v29 }
 0xa31   : > { %2795 = vmatprep.subr.mxu1 %v4504_v53 }
 0xa32   : > { %2796 = vmatpush3.msra.mxu1 %v4134_v30 }
 0xa33   : > { %2797 = vmatprep.subr.mxu1 %v4504_v53 }
 0xa34   : > { %2798 = vmatpush3.msra.mxu1 %v4138_v31 }
 0xa35   : > { %2799 = vmatprep.subr.mxu1 %v4504_v53 }
 0xa36   : > { %2800 = vmatpush3.msra.mxu1 %v4142_v32 }
 0xa37   : > { %2801 = vmatprep.subr.mxu1 %v4504_v53 }
 0xa38   : > { %2802 = vmatpush3.msra.mxu1 %v4146_v33 }
 0xa39   : > { %2803 = vmatprep.subr.mxu1 %v4504_v53  ;;  %v3024_v49 = vpop.eup %3023 }
 0xa3a   : > { %2804 = vmatpush3.msra.mxu1 %v4150_v36  ;;  %v1673_v35 = vsub.f32 1.0, %v3024_v49  ;;  %v1672_v45 = vmul.f32 %v3024_v49, %v4189_v44 }
 0xa3b   : > { %2805 = vmatprep.subr.mxu1 %v4504_v53 }
 0xa3c   : > { %2806 = vmatpush3.msra.mxu1 %v4154_v37 }
 0xa3d   : > { %2807 = vmatprep.subr.mxu1 %v4504_v53 }
 0xa3e   : > { %2808 = vmatpush3.msra.mxu1 %v4158_v39 }
 0xa3f   : > { %2809 = vmatprep.subr.mxu1 %v4504_v53 }
 0xa40   : > { %2810 = vmatpush3.msra.mxu1 %v4162_v40 }
 0xa41   : > { %2811 = vmatprep.subr.mxu1 %v4504_v53 }
 0xa42   : > { %2812 = vmatpush3.msra.mxu1 %v4166_v41 }
 0xa43   : > { %2813 = vmatprep.subr.mxu1 %v4504_v53 }
 0xa44   : > { %2814 = vmatpush3.msra.mxu1 %v4519_v6 }
 0xa45   : > { %2815 = vmatprep.subr.mxu1 %v4504_v53 }
 0xa46   : > { %2816 = vmatpush3.msra.mxu1 %v4520_v46 }
 0xa47   : > { %2817 = vmatprep.subr.mxu1 %v4504_v53 }
 0xa48   : > { %2818 = vmatpush3.msra.mxu1 %v4521_v1 }
 0xa49   : > { %2819 = vmatprep.subr.mxu1 %v4504_v53 }
 0xa4a   : > { %2820 = vmatpush3.msra.mxu1 %v4522_v56 }
 0xa4b   : > { %2824 = vmatprep.subr.mxu1 %v4504_v53 }
 0xaeb   : > { %v1666_v25 = vpop.f32.mrf.mxu1 }
 0xaec   : > { %v1670_v26 = vadd.f32 %v2411_v24, %v1666_v25 }
 0xaed   : > { %v2788_v18 = vpop.f32.mrf.mxu1 }
 0xaee   : > { %3025 = vtanh.f32 %v1670_v26 }
 0xafb   : > { %v3026_v51 = vpop.eup %3025 }
 0xafc   : > { %v1674_v56 = vmul.f32 %v3026_v51, %v1673_v35 }
 0xafe   : > { %v1675_v1 = vadd.f32 %v1674_v56, %v1672_v45 }
 0xb00   : > { %v4281_v46 = vclamps-f32 %v1675_v1, 5.0 }
 0xb02   : > { %v1679_v23 = vcombine.high %v4281_v46, %v4281_v46  ;;  %v1686_v50 = vrot.slane %v4281_v46, %v3723_v62  ;;  %1813 = vmatmul.mubr.f32.vlgmr.msra.gmra.mxu0 %v4281_v46 }
 0xb03   : > { %1983 = vmatpush1.msra.mxu0 %v4010_v38  ;;  %2046 = vmatprep.mubr.f32.mxu0 %v4504_v53 }
 0xb04   : > { %v1693_v44 = vrot.slane %v1679_v23, %v3723_v62  ;;  %v1694_v19 = vcombine.high %v1686_v50, %v1686_v50  ;;  %v1702_v1 = vrot.slane %v1686_v50, %v3723_v62  ;;  %2415 = vst.sshfl [vmem:[%s3480_s14 + $0x5] sm:$0x1 pattern:$0x73625140] %v1686_v50  ;;  %1984 = vmatprep.subr.mxu0 %v4017_v42  ;;  %v2429_v23 = vld [vmem:[%s3465_s2 + $0xa8] sm:$0xff] }
 0xb05   : > { %1985 = vmatpush1.msra.mxu0 %v4020_v43 }
 0xb06   : > { %v1695_v56 = vcombine.high %v1693_v44, %v1693_v44  ;;  %v1709_v20 = vrot.slane %v1693_v44, %v3723_v62  ;;  %v1716_v38 = vrot.slane %v1694_v19, %v3723_v62  ;;  %v1724_v21 = vcombine.high %v1702_v1, %v1702_v1  ;;  %2416 = vst.sshfl [vmem:[%s3480_s14 + $0xd] sm:$0x1 pattern:$0x73625140] %v1694_v19 }
 0xb07   : > { %2417 = vst.sshfl [vmem:[%s3480_s14 + $0x25] sm:$0x1 pattern:$0x73625140] %v1693_v44  ;;  %1986 = vmatprep.subr.mxu0 %v4027_v54 }
 0xb08   : > { %1987 = vmatpush1.msra.mxu0 %v4030_v48  ;;  %v1723_v22 = vrot.slane %v1695_v56, %v3723_v62  ;;  %v1725_v42 = vcombine.high %v1709_v20, %v1709_v20  ;;  %v1726_v24 = vcombine.high %v1716_v38, %v1716_v38  ;;  %1738 = vst [vmem:[%s3480_s14 + $0x15] sm:$0x1] %v1724_v21  ;;  %2418 = vst.sshfl [vmem:[%s3480_s14 + $0x2d] sm:$0x1 pattern:$0x73625140] %v1695_v56 }
 0xb09   : > { %1988 = vmatprep.subr.mxu0 %v4036_v63  ;;  %v2420_v48 = vld [vmem:[%s3465_s2 + $0x98] sm:$0xff] }
 0xb0a   : > { %1989 = vmatpush1.msra.mxu0 %v4039_v57  ;;  %v1727_v43 = vcombine.high %v1723_v22, %v1723_v22  ;;  %1739 = vst [vmem:[%s3480_s14 + $0x1d] sm:$0x1] %v1726_v24  ;;  %1742 = vst [vmem:[%s3480_s14 + $0x35] sm:$0x1] %v1725_v42  ;;  %v2431_v56 = vld [vmem:[%s3465_s2 + $0xb8] sm:$0xff] }
 0xb0b   : > { %1990 = vmatprep.subr.mxu0 %v4044_v34 }
 0xb0c   : > { %1991 = vmatpush1.msra.mxu0 %v4047_v59  ;;  %1743 = vst [vmem:[%s3480_s14 + $0x3d] sm:$0x1] %v1727_v43 }
 0xb0d   : > { %1992 = vmatprep.subr.mxu0 %v4051_v47 }
 0xb0e   : > { %1993 = vmatpush1.msra.mxu0 %v4054_v60 }
 0xb0f   : > { %1994 = vmatprep.subr.mxu0 %v4057_v55 }
 0xb10   : > { %1995 = vmatpush1.msra.mxu0 %v4060_v58  ;;  %v4523_v58 = vld [vmem:[#allocation17_spill] sm:$0xff] }
 0xb11   : > { %1996 = vmatprep.subr.mxu0 %v4063_v61  ;;  %v4524_v61 = vld [vmem:[#allocation18_spill] sm:$0xff] }
 0xb12   : > { %1997 = vmatpush1.msra.mxu0 %v4066_v2  ;;  %v4525_v2 = vld [vmem:[#allocation19_spill] sm:$0xff] }
 0xb13   : > { %1998 = vmatprep.subr.mxu0 %v4069_v0  ;;  %v2419_v0 = vld [vmem:[%s3465_s2 + $0x90] sm:$0xff] }
 0xb14   : > { %1999 = vmatpush1.msra.mxu0 %v4072_v52 }
 0xb15   : > { %2000 = vmatprep.subr.mxu0 %v4075_v3 }
 0xb16   : > { %2001 = vmatpush1.msra.mxu0 %v4078_v5 }
 0xb17   : > { %2002 = vmatprep.subr.mxu0 %v4081_v4 }
 0xb18   : > { %2003 = vmatpush1.msra.mxu0 %v4084_v7  ;;  %v2421_v7 = vld [vmem:[%s3465_s2 + $0xa0] sm:$0xff] }
 0xb19   : > { %2004 = vmatprep.subr.mxu0 %v4087_v8 }
 0xb1a   : > { %2005 = vmatpush1.msra.mxu0 %v4090_v9 }
 0xb1b   : > { %2006 = vmatprep.subr.mxu0 %v4093_v10 }
 0xb1c   : > { %2007 = vmatpush1.msra.mxu0 %v4096_v11 }
 0xb1d   : > { %2008 = vmatprep.subr.mxu0 %v4099_v12 }
 0xb1e   : > { %2009 = vmatpush1.msra.mxu0 %v4102_v13 }
 0xb1f   : > { %2010 = vmatprep.subr.mxu0 %v4105_v14 }
 0xb20   : > { %2011 = vmatpush1.msra.mxu0 %v4108_v15 }
 0xb21   : > { %2012 = vmatprep.subr.mxu0 %v4111_v16 }
 0xb22   : > { %2013 = vmatpush1.msra.mxu0 %v4114_v17 }
 0xbc2   : > { %v1814_v54 = vpop.f32.mrf.mxu0 }
 0xbc3   : > { %v1819_v52 = vadd.f32 %v2419_v0, %v1814_v54 }
 0xbc4   : > { %v1816_v63 = vpop.f32.mrf.mxu0 }
 0xbc5   : > { %v1826_v57 = vadd.f32 %v2420_v48, %v1816_v63  ;;  %v2422_v3 = vmul.f32 -1.442695, %v1819_v52 }
 0xbc7   : > { %v2423_v34 = vmul.f32 -1.442695, %v1826_v57 }
 0xbc9   : > { %3027 = vpow2.f32 %v2423_v34 }
 0xbd6   : > { %v3028_v59 = vpop.eup %3027 }
 0xbd7   : > { %v1830_v47 = vadd.f32 1.0, %v3028_v59 }
 0xbd9   : > { %3029 = vrcp.f32 %v1830_v47 }
 0xbda   : > { %3031 = vpow2.f32 %v2422_v3 }
 0xbe6   : > { %v3030_v60 = vpop.eup %3029 }
 0xbe7   : > { %v1833_v55 = vmul.f32 %v3030_v60, %v4281_v46  ;;  %v3032_v5 = vpop.eup %3031 }
 0xbe8   : > { %v1823_v4 = vadd.f32 1.0, %v3032_v5 }
 0xbe9   : > { %2822 = vmatmul.mubr.f32.vlgmr.msra.gmra.mxu1 %v1833_v55 }
 0xbea   : > { %2825 = vmatpush3.msra.mxu1 %v4120_v27  ;;  %2856 = vmatprep.mubr.msk.f32.mxu1 %vm3302_vm0, %v4504_v53  ;;  %3033 = vrcp.f32 %v1823_v4 }
 0xbeb   : > { %2826 = vmatprep.subr.mxu1 %v4504_v53 }
 0xbec   : > { %2827 = vmatpush3.msra.mxu1 %v4126_v28 }
 0xbed   : > { %2828 = vmatprep.subr.mxu1 %v4504_v53 }
 0xbee   : > { %2829 = vmatpush3.msra.mxu1 %v4130_v29 }
 0xbef   : > { %2830 = vmatprep.subr.mxu1 %v4504_v53 }
 0xbf0   : > { %2831 = vmatpush3.msra.mxu1 %v4134_v30 }
 0xbf1   : > { %2832 = vmatprep.subr.mxu1 %v4504_v53 }
 0xbf2   : > { %2833 = vmatpush3.msra.mxu1 %v4138_v31 }
 0xbf3   : > { %2834 = vmatprep.subr.mxu1 %v4504_v53 }
 0xbf4   : > { %2835 = vmatpush3.msra.mxu1 %v4142_v32 }
 0xbf5   : > { %2836 = vmatprep.subr.mxu1 %v4504_v53 }
 0xbf6   : > { %2837 = vmatpush3.msra.mxu1 %v4146_v33 }
 0xbf7   : > { %2838 = vmatprep.subr.mxu1 %v4504_v53  ;;  %v3034_v11 = vpop.eup %3033 }
 0xbf8   : > { %2839 = vmatpush3.msra.mxu1 %v4150_v36  ;;  %v1907_v12 = vsub.f32 1.0, %v3034_v11 }
 0xbf9   : > { %2840 = vmatprep.subr.mxu1 %v4504_v53 }
 0xbfa   : > { %2841 = vmatpush3.msra.mxu1 %v4154_v37 }
 0xbfb   : > { %2842 = vmatprep.subr.mxu1 %v4504_v53 }
 0xbfc   : > { %2843 = vmatpush3.msra.mxu1 %v4158_v39 }
 0xbfd   : > { %2844 = vmatprep.subr.mxu1 %v4504_v53 }
 0xbfe   : > { %2845 = vmatpush3.msra.mxu1 %v4162_v40 }
 0xbff   : > { %2846 = vmatprep.subr.mxu1 %v4504_v53 }
 0xc00   : > { %2847 = vmatpush3.msra.mxu1 %v4166_v41 }
 0xc01   : > { %2848 = vmatprep.subr.mxu1 %v4504_v53 }
 0xc02   : > { %2849 = vmatpush3.msra.mxu1 %v4519_v6 }
 0xc03   : > { %2850 = vmatprep.subr.mxu1 %v4504_v53 }
 0xc04   : > { %2851 = vmatpush3.msra.mxu1 %v4523_v58 }
 0xc05   : > { %2852 = vmatprep.subr.mxu1 %v4504_v53 }
 0xc06   : > { %2853 = vmatpush3.msra.mxu1 %v4524_v61 }
 0xc07   : > { %2854 = vmatprep.subr.mxu1 %v4504_v53  ;;  %v1906_v53 = vmul.f32 %v3034_v11, %v4281_v46  ;;  %v2430_v46 = vld [vmem:[%s3465_s2 + $0xb0] sm:$0xff] }
 0xc08   : > { %2855 = vmatpush3.msra.mxu1 %v4525_v2 }
 0xca9   : > { %v1900_v8 = vpop.f32.mrf.mxu1 }
 0xcaa   : > { %v1904_v9 = vadd.f32 %v2421_v7, %v1900_v8 }
 0xcab   : > { %v2823_v10 = vpop.f32.mrf.mxu1 }
 0xcac   : > { %3035 = vtanh.f32 %v1904_v9 }
 0xcb9   : > { %v3036_v13 = vpop.eup %3035 }
 0xcba   : > { %v1908_v14 = vmul.f32 %v3036_v13, %v1907_v12 }
 0xcbc   : > { %v1909_v15 = vadd.f32 %v1908_v14, %v1906_v53 }
 0xcbe   : > { %v2424_v16 = vclamps-f32 %v1909_v15, 5.0 }
 0xcc0   : > { %v1913_v17 = vcombine.high %v2424_v16, %v2424_v16  ;;  %v1920_v27 = vrot.slane %v2424_v16, %v3723_v62  ;;  %2047 = vmatmul.mubr.f32.vlgmr.msra.gmra.mxu0 %v2424_v16 }
 0xcc2   : > { %v1927_v28 = vrot.slane %v1913_v17, %v3723_v62  ;;  %v1928_v29 = vcombine.high %v1920_v27, %v1920_v27  ;;  %v1936_v30 = vrot.slane %v1920_v27, %v3723_v62  ;;  %2425 = vst.sshfl [vmem:[%s3480_s14 + $0x6] sm:$0x1 pattern:$0x73625140] %v1920_v27 }
 0xcc4   : > { %v1929_v31 = vcombine.high %v1927_v28, %v1927_v28  ;;  %v1943_v32 = vrot.slane %v1927_v28, %v3723_v62  ;;  %v1950_v33 = vrot.slane %v1928_v29, %v3723_v62  ;;  %v1958_v36 = vcombine.high %v1936_v30, %v1936_v30  ;;  %2426 = vst.sshfl [vmem:[%s3480_s14 + $0xe] sm:$0x1 pattern:$0x73625140] %v1928_v29 }
 0xcc5   : > { %2427 = vst.sshfl [vmem:[%s3480_s14 + $0x26] sm:$0x1 pattern:$0x73625140] %v1927_v28 }
 0xcc6   : > { %v1957_v37 = vrot.slane %v1929_v31, %v3723_v62  ;;  %v1959_v39 = vcombine.high %v1943_v32, %v1943_v32  ;;  %v1960_v40 = vcombine.high %v1950_v33, %v1950_v33  ;;  %1972 = vst [vmem:[%s3480_s14 + $0x16] sm:$0x1] %v1958_v36  ;;  %2428 = vst.sshfl [vmem:[%s3480_s14 + $0x2e] sm:$0x1 pattern:$0x73625140] %v1929_v31 }
 0xcc8   : > { %v1961_v41 = vcombine.high %v1957_v37, %v1957_v37  ;;  %1973 = vst [vmem:[%s3480_s14 + $0x1e] sm:$0x1] %v1960_v40  ;;  %1976 = vst [vmem:[%s3480_s14 + $0x36] sm:$0x1] %v1959_v39 }
 0xcca   : > { %1977 = vst [vmem:[%s3480_s14 + $0x3e] sm:$0x1] %v1961_v41 }
 0xd80   : > { %v2048_v6 = vpop.f32.mrf.mxu0 }
 0xd81   : > { %v2053_v50 = vadd.f32 %v2429_v23, %v2048_v6 }
 0xd82   : > { %v2050_v25 = vpop.f32.mrf.mxu0 }
 0xd83   : > { %v2060_v26 = vadd.f32 %v2430_v46, %v2050_v25  ;;  %v2432_v44 = vmul.f32 -1.442695, %v2053_v50 }
 0xd85   : > { %v2433_v18 = vmul.f32 -1.442695, %v2060_v26 }
 0xd87   : > { %3037 = vpow2.f32 %v2433_v18 }
 0xd94   : > { %v3038_v49 = vpop.eup %3037 }
 0xd95   : > { %v2064_v35 = vadd.f32 1.0, %v3038_v49 }
 0xd97   : > { %3039 = vrcp.f32 %v2064_v35 }
 0xd98   : > { %3041 = vpow2.f32 %v2432_v44 }
 0xda4   : > { %v3040_v51 = vpop.eup %3039 }
 0xda5   : > { %v2067_v45 = vmul.f32 %v3040_v51, %v2424_v16  ;;  %v3042_v19 = vpop.eup %3041 }
 0xda6   : > { %v2057_v1 = vadd.f32 1.0, %v3042_v19 }
 0xda7   : > { %2857 = vmatmul.mubr.f32.vlgmr.msra.gmra.mxu1 %v2067_v45 }
 0xda8   : > { %3043 = vrcp.f32 %v2057_v1 }
 0xdb5   : > { %v3044_v22 = vpop.eup %3043 }
 0xdb6   : > { %v2141_v42 = vsub.f32 1.0, %v3044_v22  ;;  %v2140_v43 = vmul.f32 %v3044_v22, %v2424_v16 }
 0xe67   : > { %v2134_v20 = vpop.f32.mrf.mxu1 }
 0xe68   : > { %v2138_v38 = vadd.f32 %v2431_v56, %v2134_v20 }
 0xe69   : > { %v2858_v21 = vpop.f32.mrf.mxu1 }
 0xe6a   : > { %3045 = vtanh.f32 %v2138_v38 }
 0xe77   : > { %v3046_v24 = vpop.eup %3045 }
 0xe78   : > { %v2142_v54 = vmul.f32 %v3046_v24, %v2141_v42 }
 0xe7a   : > { %v2143_v48 = vadd.f32 %v2142_v54, %v2140_v43 }
 0xe7c   : > { %v2434_v63 = vclamps-f32 %v2143_v48, 5.0 }
 0xe7e   : > { %v2147_v57 = vcombine.high %v2434_v63, %v2434_v63  ;;  %v2154_v34 = vrot.slane %v2434_v63, %v3723_v62  ;;  %2212 = vst [vmem:[#allocation2] sm:$0xff] %v2434_v63 }
 0xe80   : > { %v2161_v59 = vrot.slane %v2147_v57, %v3723_v62  ;;  %v2162_v47 = vcombine.high %v2154_v34, %v2154_v34  ;;  %v2170_v60 = vrot.slane %v2154_v34, %v3723_v62  ;;  %2435 = vst.sshfl [vmem:[%s3480_s14 + $0x7] sm:$0x1 pattern:$0x73625140] %v2154_v34 }
 0xe82   : > { %v2163_v55 = vcombine.high %v2161_v59, %v2161_v59  ;;  %v2177_v58 = vrot.slane %v2161_v59, %v3723_v62  ;;  %v2184_v61 = vrot.slane %v2162_v47, %v3723_v62  ;;  %v2192_v2 = vcombine.high %v2170_v60, %v2170_v60  ;;  %2436 = vst.sshfl [vmem:[%s3480_s14 + $0xf] sm:$0x1 pattern:$0x73625140] %v2162_v47 }
 0xe83   : > { %2437 = vst.sshfl [vmem:[%s3480_s14 + $0x27] sm:$0x1 pattern:$0x73625140] %v2161_v59 }
 0xe84   : > { %v2191_v0 = vrot.slane %v2163_v55, %v3723_v62  ;;  %v2193_v52 = vcombine.high %v2177_v58, %v2177_v58  ;;  %v2194_v3 = vcombine.high %v2184_v61, %v2184_v61  ;;  %2206 = vst [vmem:[%s3480_s14 + $0x17] sm:$0x1] %v2192_v2  ;;  %2438 = vst.sshfl [vmem:[%s3480_s14 + $0x2f] sm:$0x1 pattern:$0x73625140] %v2163_v55 }
 0xe86   : > { %v2195_v5 = vcombine.high %v2191_v0, %v2191_v0  ;;  %2207 = vst [vmem:[%s3480_s14 + $0x1f] sm:$0x1] %v2194_v3  ;;  %2210 = vst [vmem:[%s3480_s14 + $0x37] sm:$0x1] %v2193_v52 }
 0xe88   : > { %2211 = vst [vmem:[%s3480_s14 + $0x3f] sm:$0x1] %v2195_v5 }
 0xe89   : > { %3214 = shalt.err (!%p3211_p8)
}
 0xe8a   : > { %s3215_s12 = scalar_lea.hbm %s4404_s22, 1024  ;;  %s3219_s13 = scalar_lea.hbm %s4461_s4, 2048 }
 0xe8b   : > { %p3216_p12 = scmp.ne.s32.totalorder %s4404_s22, %s3215_s12  ;;  %p3220_p0 = scmp.lt.s32.totalorder %s4404_s22, %s4461_s4 }
 0xe8c   : > { %p3221_p9 = scmp.lt.s32.totalorder %s3219_s13, %s3215_s12 }
 0xe8d   : > { %p3217_p7 = pnand %p3216_p12, %p3433_p13 }
 0xe8e   : > { %p3222_p1 = por %p3221_p9, %p3220_p0 }
 0xe8f   : > { %p3218_p10 = pneg %p3217_p7 }
 0xe91   : > { %p3223_p11 = pnand %p3222_p1, %p3218_p10 }
 0xe93   : > { %3226 = shalt.err (!%p3223_p11)
}
 0xe94   : > { %s3305_s27 = smov 128   ;;  %s3306_s14 = smov 256  }
 0xe95   : > { %s3307_s23 = smov 8  }
 0xe96   : > { %2876 = dma.vmem_to_hbm [thread:$0]  (%p3433_p13), %s4406_s25, 1024, %s4404_s22, %s2214_s28, %s3305_s27, %s3306_s14, %s3307_s23  }
 0xe97 PF: > { %s2244_s18 = sand.u32 1, %s3269_s15   ;;  %p4526_p6 = scmp.ne.s32.totalorder %s4489_s26, 0 }
 0xe98   : > { %p4527_p3 = scmp.ge.s32.totalorder %s3289_s20, 2  ;;  %s2245_s21 = scalar_lea.sflag [#allocation5], %s2244_s18 }
 0xe9a   : > { %p2893_p5 = pnand %p4527_p3, %p4526_p6 }
 0xe9c   : > { %p2894_p4 = pneg %p2893_p5 }
 0xe9e   : > { %3264 = dma.done.wait (%p2894_p4), %s2245_s21, 1024  }
 0xe9f   : > { %3266 = vsyncadd (%p2894_p4), %s2245_s21, 4294966272  ;;  %s22_s20 = sadd.s32 1, %s3289_s20   ;;  %s4528_s15 = smov %s3273_s16 }
 0xea0   : > { %p19_p2 = scmp.ge.s32.totalorder %s22_s20, 4   ;;  %s4529_s16 = smov %s3277_s17 }
 0xea1   : > { %s4530_s17 = smov %s3449_s24  ;;  %s4531_s18 = smov %s3285_s19 }
 0xea2   : > { %s4532_s19 = smov %s4534_s10  ;;  %21 = sbr.rel (!%p19_p2) target bundleno = 11 (0xb), region = 105 }
 0xea7   :  { %2250 = vsyncpa [#allocation4], 1 }
 0xea8   :  { %2252 = vsyncpa [#allocation4 + $0x1], 1 }
 0xea9   :  { %2253 = vsyncpa [#allocation7], 1 }
 0xeaa   :  { %2254 = vsyncpa [#allocation10], 1 }
 0xeab   :  { %2255 = vsyncpa [#allocation5], 1 }
 0xeac   :  { %2257 = vsyncpa [#allocation5 + $0x1], 1 }

</bundles_post_ra>
